<compile_context>
chip_gen: v7x
topology: tpu7x:2x2x1
jax: 0.10.0
libtpu: 0.0.40
codegen_flags: <defaults>
</compile_context>

<pallas_src>
import jax
import jax.numpy as jnp
from jax.experimental import pallas as pl
from jax.experimental.pallas import tpu as pltpu

EPS = 1e-5
DIMS = [1, 32, 64, 128, 256, 128, 64, 32, 1]   # layer1..layer8 in/out sizes
F = 256                                        # padded feature width (max dim)


# ---------------------------------------------------------------- kernel ----
def ann_kernel(x_ref, w_ref, vec_ref, b8_ref, out_ref):
    # x_ref:  (B, 1)       input
    # w_ref:  (6, F, F)    zero-padded weights of layers 2..7 (in, out)
    # vec_ref:(16, F)      rows 0-6: gamma1..7, rows 7-13: beta1..7,
    #                      row 14: w1 row (1x32 padded), row 15: w8 row (32 padded)
    # b8_ref: (1,) SMEM    bias of layer 8
    x = x_ref[...]                       # (B, 1)
    vec = vec_ref[...]                   # (16, F)

    def bn_relu(h, i):
        # Training-mode BatchNorm1d, single-pass batch statistics.
        m = jnp.mean(h, axis=0, keepdims=True)                  # (1, F)
        ms = jnp.mean(h * h, axis=0, keepdims=True)              # (1, F)
        var = jnp.maximum(ms - m * m, 0.0)
        scale = vec[i:i + 1, :] * jax.lax.rsqrt(var + EPS)       # gamma folded
        shift = vec[7 + i:8 + i, :] - m * scale                  # beta - mean*scale
        return jnp.maximum(h * scale + shift, 0.0)

    # layer 1: (B,1) @ (1,32) -> VPU broadcast multiply (bias cancels under BN)
    x1 = bn_relu(x * vec[14:15, :], 0)                                           # (B, F)
    x2 = bn_relu(jnp.dot(x1, w_ref[0], preferred_element_type=jnp.float32), 1)
    x3 = bn_relu(jnp.dot(x2, w_ref[1], preferred_element_type=jnp.float32), 2)
    mid = bn_relu(jnp.dot(x3, w_ref[2], preferred_element_type=jnp.float32), 3)
    x5 = bn_relu(jnp.dot(mid, w_ref[3], preferred_element_type=jnp.float32), 4) + x3
    x6 = bn_relu(jnp.dot(x5, w_ref[4], preferred_element_type=jnp.float32), 5) + x2
    x7 = bn_relu(jnp.dot(x6, w_ref[5], preferred_element_type=jnp.float32), 6) + x1
    # layer 8: (B,32) @ (32,1) -> XLU lane reduce instead of a width-1 matmul
    out = jnp.sum(x7 * vec[15:16, :], axis=-1, keepdims=True) + b8_ref[0]
    out_ref[...] = out.astype(out_ref.dtype)


# ---------------------------------------------------------- param packing ---
def pack_params(params):
    """One-time packing of the module parameters into kernel operands."""
    w_slab = jnp.zeros((6, F, F), jnp.float32)
    for idx, layer in enumerate(range(2, 8)):
        w = params[f"w{layer}"]                                # (in, out)
        w_slab = w_slab.at[idx, :w.shape[0], :w.shape[1]].set(w)

    vec = jnp.zeros((16, F), jnp.float32)
    for i in range(1, 8):
        g = params[f"g{i}"].reshape(-1)
        be = params[f"be{i}"].reshape(-1)
        vec = vec.at[i - 1, :g.shape[0]].set(g)                # gamma_i -> row i-1
        vec = vec.at[6 + i, :be.shape[0]].set(be)              # beta_i  -> row 6+i
    vec = vec.at[14, :DIMS[1]].set(params["w1"].reshape(-1))   # w1 (1,32) -> row 14
    vec = vec.at[15, :DIMS[7]].set(params["w8"].reshape(-1))   # w8 (32,1) -> row 15

    b8 = params["b8"].reshape(1).astype(jnp.float32)
    # NOTE: b1..b7 are intentionally NOT packed: they cancel exactly under
    # training-mode BatchNorm mean-centering.
    return w_slab, vec, b8


# --------------------------------------------------------------- wrapper ----
def ann_forward(x, packed):
    w_slab, vec, b8 = packed
    B = x.shape[0]
    return pl.pallas_call(
        ann_kernel,
        out_shape=jax.ShapeDtypeStruct((B, 1), jnp.float32),
        in_specs=[
            pl.BlockSpec(memory_space=pltpu.MemorySpace.VMEM),   # x
            pl.BlockSpec(memory_space=pltpu.MemorySpace.VMEM),   # weight slab
            pl.BlockSpec(memory_space=pltpu.MemorySpace.VMEM),   # vector slab
            pl.BlockSpec(memory_space=pltpu.MemorySpace.SMEM),   # b8 scalar
        ],
        out_specs=pl.BlockSpec(memory_space=pltpu.MemorySpace.VMEM),
    )(x, w_slab, vec, b8)


# ----------------------------------------------------------- param init -----
def init_params(key):
    params = {}
    for i in range(8):
        fan_in, fan_out = DIMS[i], DIMS[i + 1]
        key, kw, kb = jax.random.split(key, 3)
        bound = 1.0 / float(fan_in) ** 0.5
        params[f"w{i+1}"] = jax.random.uniform(
            kw, (fan_in, fan_out), jnp.float32, -bound, bound)
        params[f"b{i+1}"] = jax.random.uniform(
            kb, (1, fan_out), jnp.float32, -bound, bound)
        if i < 7:
            params[f"g{i+1}"] = jnp.ones((1, fan_out), jnp.float32)
            params[f"be{i+1}"] = jnp.zeros((1, fan_out), jnp.float32)
    return params


# ------------------------------------------------------- pure-JAX check -----
def ann_reference(x, params):
    """Exact PyTorch semantics: biases included, two-pass biased variance."""
    def bn_relu(h, g, be):
        m = h.mean(0, keepdims=True)
        v = ((h - m) ** 2).mean(0, keepdims=True)
        return jnp.maximum((h - m) / jnp.sqrt(v + EPS) * g + be, 0.0)

    def lin(h, i):
        return h @ params[f"w{i}"] + params[f"b{i}"]

    x1 = bn_relu(lin(x, 1), params["g1"], params["be1"])
    x2 = bn_relu(lin(x1, 2), params["g2"], params["be2"])
    x3 = bn_relu(lin(x2, 3), params["g3"], params["be3"])
    mid = bn_relu(lin(x3, 4), params["g4"], params["be4"])
    h = bn_relu(lin(mid, 5), params["g5"], params["be5"]) + x3
    h = bn_relu(lin(h, 6), params["g6"], params["be6"]) + x2
    h = bn_relu(lin(h, 7), params["g7"], params["be7"]) + x1
    return lin(h, 8)


# ------------------------------------------------------------------ main ----
if __name__ == "__main__":
    key = jax.random.PRNGKey(0)
    k_param, k_x = jax.random.split(key)
    params = init_params(k_param)
    packed = pack_params(params)
    x = jax.random.normal(k_x, (8, 1), jnp.float32)   # batch=8, in_features=1

    out = jax.block_until_ready(ann_forward(x, packed))
    ref = jax.block_until_ready(ann_reference(x, params))

    assert out.shape == (8, 1), out.shape
    assert jnp.allclose(out, ref, atol=1e-3, rtol=1e-3), (out, ref)
    print("KERNEL_OK")
</pallas_src>

<mosaic_0001>
module attributes {stable_mosaic.version = 11 : i64} {
  func.func @ann_kernel(%arg0: memref<8x1xf32, #tpu.memory_space<vmem>>, %arg1: memref<6x256x256xf32, #tpu.memory_space<vmem>>, %arg2: memref<16x256xf32, #tpu.memory_space<vmem>>, %arg3: memref<1xf32, #tpu.memory_space<smem>>, %arg4: memref<8x1xf32, #tpu.memory_space<vmem>>) attributes {dimension_semantics = [], scalar_prefetch = 0 : i64, scratch_operands = 0 : i64, tpu.core_type = #tpu.core_type<tc>} {
    %c0 = arith.constant 0 : index
    %c0_0 = arith.constant 0 : index
    %0 = vector.load %arg0[%c0, %c0_0] : memref<8x1xf32, #tpu.memory_space<vmem>>, vector<8x1xf32>
    %c0_1 = arith.constant 0 : index
    %c0_2 = arith.constant 0 : index
    %1 = vector.load %arg2[%c0_1, %c0_2] : memref<16x256xf32, #tpu.memory_space<vmem>>, vector<16x256xf32>
    %2 = vector.extract_strided_slice %1 {offsets = [14, 0], sizes = [1, 256], strides = [1, 1]} : vector<16x256xf32> to vector<1x256xf32>
    %3 = vector.broadcast %0 : vector<8x1xf32> to vector<8x256xf32>
    %4 = vector.broadcast %2 : vector<1x256xf32> to vector<8x256xf32>
    %5 = arith.mulf %3, %4 : vector<8x256xf32>
    %cst = arith.constant dense<0.000000e+00> : vector<256xf32>
    %6 = vector.multi_reduction <add>, %5, %cst [0] : vector<8x256xf32> to vector<256xf32>
    %7 = vector.shape_cast %6 : vector<256xf32> to vector<1x256xf32>
    %cst_3 = arith.constant 8.000000e+00 : f32
    %8 = vector.broadcast %cst_3 : f32 to vector<1x256xf32>
    %9 = arith.divf %7, %8 : vector<1x256xf32>
    %10 = arith.mulf %5, %5 : vector<8x256xf32>
    %cst_4 = arith.constant dense<0.000000e+00> : vector<256xf32>
    %11 = vector.multi_reduction <add>, %10, %cst_4 [0] : vector<8x256xf32> to vector<256xf32>
    %12 = vector.shape_cast %11 : vector<256xf32> to vector<1x256xf32>
    %cst_5 = arith.constant 8.000000e+00 : f32
    %13 = vector.broadcast %cst_5 : f32 to vector<1x256xf32>
    %14 = arith.divf %12, %13 : vector<1x256xf32>
    %15 = arith.mulf %9, %9 : vector<1x256xf32>
    %16 = arith.subf %14, %15 : vector<1x256xf32>
    %cst_6 = arith.constant 0.000000e+00 : f32
    %17 = vector.broadcast %cst_6 : f32 to vector<1x256xf32>
    %18 = arith.maximumf %16, %17 : vector<1x256xf32>
    %19 = vector.extract_strided_slice %1 {offsets = [0, 0], sizes = [1, 256], strides = [1, 1]} : vector<16x256xf32> to vector<1x256xf32>
    %cst_7 = arith.constant 9.99999974E-6 : f32
    %20 = vector.broadcast %cst_7 : f32 to vector<1x256xf32>
    %21 = arith.addf %18, %20 : vector<1x256xf32>
    %22 = math.rsqrt %21 : vector<1x256xf32>
    %23 = arith.mulf %19, %22 : vector<1x256xf32>
    %24 = vector.extract_strided_slice %1 {offsets = [7, 0], sizes = [1, 256], strides = [1, 1]} : vector<16x256xf32> to vector<1x256xf32>
    %25 = arith.mulf %9, %23 : vector<1x256xf32>
    %26 = arith.subf %24, %25 : vector<1x256xf32>
    %27 = vector.broadcast %23 : vector<1x256xf32> to vector<8x256xf32>
    %28 = arith.mulf %5, %27 : vector<8x256xf32>
    %29 = vector.broadcast %26 : vector<1x256xf32> to vector<8x256xf32>
    %30 = arith.addf %28, %29 : vector<8x256xf32>
    %cst_8 = arith.constant 0.000000e+00 : f32
    %31 = vector.broadcast %cst_8 : f32 to vector<8x256xf32>
    %32 = arith.maximumf %30, %31 : vector<8x256xf32>
    %c0_9 = arith.constant 0 : index
    %c0_10 = arith.constant 0 : index
    %c0_11 = arith.constant 0 : index
    %33 = vector.load %arg1[%c0_9, %c0_10, %c0_11] : memref<6x256x256xf32, #tpu.memory_space<vmem>>, vector<1x256x256xf32>
    %34 = vector.shape_cast %33 : vector<1x256x256xf32> to vector<256x256xf32>
    %cst_12 = arith.constant dense<0.000000e+00> : vector<8x256xf32>
    %35 = tpu.matmul %32, %34, %cst_12 {dimension_numbers = #tpu.dot_dimension_numbers<[1], [0], [0], [1], [0, 0, 1, 1], [], []>} : vector<8x256xf32>, vector<256x256xf32>, vector<8x256xf32> -> vector<8x256xf32>
    %cst_13 = arith.constant dense<0.000000e+00> : vector<256xf32>
    %36 = vector.multi_reduction <add>, %35, %cst_13 [0] : vector<8x256xf32> to vector<256xf32>
    %37 = vector.shape_cast %36 : vector<256xf32> to vector<1x256xf32>
    %cst_14 = arith.constant 8.000000e+00 : f32
    %38 = vector.broadcast %cst_14 : f32 to vector<1x256xf32>
    %39 = arith.divf %37, %38 : vector<1x256xf32>
    %40 = arith.mulf %35, %35 : vector<8x256xf32>
    %cst_15 = arith.constant dense<0.000000e+00> : vector<256xf32>
    %41 = vector.multi_reduction <add>, %40, %cst_15 [0] : vector<8x256xf32> to vector<256xf32>
    %42 = vector.shape_cast %41 : vector<256xf32> to vector<1x256xf32>
    %cst_16 = arith.constant 8.000000e+00 : f32
    %43 = vector.broadcast %cst_16 : f32 to vector<1x256xf32>
    %44 = arith.divf %42, %43 : vector<1x256xf32>
    %45 = arith.mulf %39, %39 : vector<1x256xf32>
    %46 = arith.subf %44, %45 : vector<1x256xf32>
    %cst_17 = arith.constant 0.000000e+00 : f32
    %47 = vector.broadcast %cst_17 : f32 to vector<1x256xf32>
    %48 = arith.maximumf %46, %47 : vector<1x256xf32>
    %49 = vector.extract_strided_slice %1 {offsets = [1, 0], sizes = [1, 256], strides = [1, 1]} : vector<16x256xf32> to vector<1x256xf32>
    %cst_18 = arith.constant 9.99999974E-6 : f32
    %50 = vector.broadcast %cst_18 : f32 to vector<1x256xf32>
    %51 = arith.addf %48, %50 : vector<1x256xf32>
    %52 = math.rsqrt %51 : vector<1x256xf32>
    %53 = arith.mulf %49, %52 : vector<1x256xf32>
    %54 = vector.extract_strided_slice %1 {offsets = [8, 0], sizes = [1, 256], strides = [1, 1]} : vector<16x256xf32> to vector<1x256xf32>
    %55 = arith.mulf %39, %53 : vector<1x256xf32>
    %56 = arith.subf %54, %55 : vector<1x256xf32>
    %57 = vector.broadcast %53 : vector<1x256xf32> to vector<8x256xf32>
    %58 = arith.mulf %35, %57 : vector<8x256xf32>
    %59 = vector.broadcast %56 : vector<1x256xf32> to vector<8x256xf32>
    %60 = arith.addf %58, %59 : vector<8x256xf32>
    %cst_19 = arith.constant 0.000000e+00 : f32
    %61 = vector.broadcast %cst_19 : f32 to vector<8x256xf32>
    %62 = arith.maximumf %60, %61 : vector<8x256xf32>
    %c1 = arith.constant 1 : index
    %c0_20 = arith.constant 0 : index
    %c0_21 = arith.constant 0 : index
    %63 = vector.load %arg1[%c1, %c0_20, %c0_21] : memref<6x256x256xf32, #tpu.memory_space<vmem>>, vector<1x256x256xf32>
    %64 = vector.shape_cast %63 : vector<1x256x256xf32> to vector<256x256xf32>
    %cst_22 = arith.constant dense<0.000000e+00> : vector<8x256xf32>
    %65 = tpu.matmul %62, %64, %cst_22 {dimension_numbers = #tpu.dot_dimension_numbers<[1], [0], [0], [1], [0, 0, 1, 1], [], []>} : vector<8x256xf32>, vector<256x256xf32>, vector<8x256xf32> -> vector<8x256xf32>
    %cst_23 = arith.constant dense<0.000000e+00> : vector<256xf32>
    %66 = vector.multi_reduction <add>, %65, %cst_23 [0] : vector<8x256xf32> to vector<256xf32>
    %67 = vector.shape_cast %66 : vector<256xf32> to vector<1x256xf32>
    %cst_24 = arith.constant 8.000000e+00 : f32
    %68 = vector.broadcast %cst_24 : f32 to vector<1x256xf32>
    %69 = arith.divf %67, %68 : vector<1x256xf32>
    %70 = arith.mulf %65, %65 : vector<8x256xf32>
    %cst_25 = arith.constant dense<0.000000e+00> : vector<256xf32>
    %71 = vector.multi_reduction <add>, %70, %cst_25 [0] : vector<8x256xf32> to vector<256xf32>
    %72 = vector.shape_cast %71 : vector<256xf32> to vector<1x256xf32>
    %cst_26 = arith.constant 8.000000e+00 : f32
    %73 = vector.broadcast %cst_26 : f32 to vector<1x256xf32>
    %74 = arith.divf %72, %73 : vector<1x256xf32>
    %75 = arith.mulf %69, %69 : vector<1x256xf32>
    %76 = arith.subf %74, %75 : vector<1x256xf32>
    %cst_27 = arith.constant 0.000000e+00 : f32
    %77 = vector.broadcast %cst_27 : f32 to vector<1x256xf32>
    %78 = arith.maximumf %76, %77 : vector<1x256xf32>
    %79 = vector.extract_strided_slice %1 {offsets = [2, 0], sizes = [1, 256], strides = [1, 1]} : vector<16x256xf32> to vector<1x256xf32>
    %cst_28 = arith.constant 9.99999974E-6 : f32
    %80 = vector.broadcast %cst_28 : f32 to vector<1x256xf32>
    %81 = arith.addf %78, %80 : vector<1x256xf32>
    %82 = math.rsqrt %81 : vector<1x256xf32>
    %83 = arith.mulf %79, %82 : vector<1x256xf32>
    %84 = vector.extract_strided_slice %1 {offsets = [9, 0], sizes = [1, 256], strides = [1, 1]} : vector<16x256xf32> to vector<1x256xf32>
    %85 = arith.mulf %69, %83 : vector<1x256xf32>
    %86 = arith.subf %84, %85 : vector<1x256xf32>
    %87 = vector.broadcast %83 : vector<1x256xf32> to vector<8x256xf32>
    %88 = arith.mulf %65, %87 : vector<8x256xf32>
    %89 = vector.broadcast %86 : vector<1x256xf32> to vector<8x256xf32>
    %90 = arith.addf %88, %89 : vector<8x256xf32>
    %cst_29 = arith.constant 0.000000e+00 : f32
    %91 = vector.broadcast %cst_29 : f32 to vector<8x256xf32>
    %92 = arith.maximumf %90, %91 : vector<8x256xf32>
    %c2 = arith.constant 2 : index
    %c0_30 = arith.constant 0 : index
    %c0_31 = arith.constant 0 : index
    %93 = vector.load %arg1[%c2, %c0_30, %c0_31] : memref<6x256x256xf32, #tpu.memory_space<vmem>>, vector<1x256x256xf32>
    %94 = vector.shape_cast %93 : vector<1x256x256xf32> to vector<256x256xf32>
    %cst_32 = arith.constant dense<0.000000e+00> : vector<8x256xf32>
    %95 = tpu.matmul %92, %94, %cst_32 {dimension_numbers = #tpu.dot_dimension_numbers<[1], [0], [0], [1], [0, 0, 1, 1], [], []>} : vector<8x256xf32>, vector<256x256xf32>, vector<8x256xf32> -> vector<8x256xf32>
    %cst_33 = arith.constant dense<0.000000e+00> : vector<256xf32>
    %96 = vector.multi_reduction <add>, %95, %cst_33 [0] : vector<8x256xf32> to vector<256xf32>
    %97 = vector.shape_cast %96 : vector<256xf32> to vector<1x256xf32>
    %cst_34 = arith.constant 8.000000e+00 : f32
    %98 = vector.broadcast %cst_34 : f32 to vector<1x256xf32>
    %99 = arith.divf %97, %98 : vector<1x256xf32>
    %100 = arith.mulf %95, %95 : vector<8x256xf32>
    %cst_35 = arith.constant dense<0.000000e+00> : vector<256xf32>
    %101 = vector.multi_reduction <add>, %100, %cst_35 [0] : vector<8x256xf32> to vector<256xf32>
    %102 = vector.shape_cast %101 : vector<256xf32> to vector<1x256xf32>
    %cst_36 = arith.constant 8.000000e+00 : f32
    %103 = vector.broadcast %cst_36 : f32 to vector<1x256xf32>
    %104 = arith.divf %102, %103 : vector<1x256xf32>
    %105 = arith.mulf %99, %99 : vector<1x256xf32>
    %106 = arith.subf %104, %105 : vector<1x256xf32>
    %cst_37 = arith.constant 0.000000e+00 : f32
    %107 = vector.broadcast %cst_37 : f32 to vector<1x256xf32>
    %108 = arith.maximumf %106, %107 : vector<1x256xf32>
    %109 = vector.extract_strided_slice %1 {offsets = [3, 0], sizes = [1, 256], strides = [1, 1]} : vector<16x256xf32> to vector<1x256xf32>
    %cst_38 = arith.constant 9.99999974E-6 : f32
    %110 = vector.broadcast %cst_38 : f32 to vector<1x256xf32>
    %111 = arith.addf %108, %110 : vector<1x256xf32>
    %112 = math.rsqrt %111 : vector<1x256xf32>
    %113 = arith.mulf %109, %112 : vector<1x256xf32>
    %114 = vector.extract_strided_slice %1 {offsets = [10, 0], sizes = [1, 256], strides = [1, 1]} : vector<16x256xf32> to vector<1x256xf32>
    %115 = arith.mulf %99, %113 : vector<1x256xf32>
    %116 = arith.subf %114, %115 : vector<1x256xf32>
    %117 = vector.broadcast %113 : vector<1x256xf32> to vector<8x256xf32>
    %118 = arith.mulf %95, %117 : vector<8x256xf32>
    %119 = vector.broadcast %116 : vector<1x256xf32> to vector<8x256xf32>
    %120 = arith.addf %118, %119 : vector<8x256xf32>
    %cst_39 = arith.constant 0.000000e+00 : f32
    %121 = vector.broadcast %cst_39 : f32 to vector<8x256xf32>
    %122 = arith.maximumf %120, %121 : vector<8x256xf32>
    %c3 = arith.constant 3 : index
    %c0_40 = arith.constant 0 : index
    %c0_41 = arith.constant 0 : index
    %123 = vector.load %arg1[%c3, %c0_40, %c0_41] : memref<6x256x256xf32, #tpu.memory_space<vmem>>, vector<1x256x256xf32>
    %124 = vector.shape_cast %123 : vector<1x256x256xf32> to vector<256x256xf32>
    %cst_42 = arith.constant dense<0.000000e+00> : vector<8x256xf32>
    %125 = tpu.matmul %122, %124, %cst_42 {dimension_numbers = #tpu.dot_dimension_numbers<[1], [0], [0], [1], [0, 0, 1, 1], [], []>} : vector<8x256xf32>, vector<256x256xf32>, vector<8x256xf32> -> vector<8x256xf32>
    %cst_43 = arith.constant dense<0.000000e+00> : vector<256xf32>
    %126 = vector.multi_reduction <add>, %125, %cst_43 [0] : vector<8x256xf32> to vector<256xf32>
    %127 = vector.shape_cast %126 : vector<256xf32> to vector<1x256xf32>
    %cst_44 = arith.constant 8.000000e+00 : f32
    %128 = vector.broadcast %cst_44 : f32 to vector<1x256xf32>
    %129 = arith.divf %127, %128 : vector<1x256xf32>
    %130 = arith.mulf %125, %125 : vector<8x256xf32>
    %cst_45 = arith.constant dense<0.000000e+00> : vector<256xf32>
    %131 = vector.multi_reduction <add>, %130, %cst_45 [0] : vector<8x256xf32> to vector<256xf32>
    %132 = vector.shape_cast %131 : vector<256xf32> to vector<1x256xf32>
    %cst_46 = arith.constant 8.000000e+00 : f32
    %133 = vector.broadcast %cst_46 : f32 to vector<1x256xf32>
    %134 = arith.divf %132, %133 : vector<1x256xf32>
    %135 = arith.mulf %129, %129 : vector<1x256xf32>
    %136 = arith.subf %134, %135 : vector<1x256xf32>
    %cst_47 = arith.constant 0.000000e+00 : f32
    %137 = vector.broadcast %cst_47 : f32 to vector<1x256xf32>
    %138 = arith.maximumf %136, %137 : vector<1x256xf32>
    %139 = vector.extract_strided_slice %1 {offsets = [4, 0], sizes = [1, 256], strides = [1, 1]} : vector<16x256xf32> to vector<1x256xf32>
    %cst_48 = arith.constant 9.99999974E-6 : f32
    %140 = vector.broadcast %cst_48 : f32 to vector<1x256xf32>
    %141 = arith.addf %138, %140 : vector<1x256xf32>
    %142 = math.rsqrt %141 : vector<1x256xf32>
    %143 = arith.mulf %139, %142 : vector<1x256xf32>
    %144 = vector.extract_strided_slice %1 {offsets = [11, 0], sizes = [1, 256], strides = [1, 1]} : vector<16x256xf32> to vector<1x256xf32>
    %145 = arith.mulf %129, %143 : vector<1x256xf32>
    %146 = arith.subf %144, %145 : vector<1x256xf32>
    %147 = vector.broadcast %143 : vector<1x256xf32> to vector<8x256xf32>
    %148 = arith.mulf %125, %147 : vector<8x256xf32>
    %149 = vector.broadcast %146 : vector<1x256xf32> to vector<8x256xf32>
    %150 = arith.addf %148, %149 : vector<8x256xf32>
    %cst_49 = arith.constant 0.000000e+00 : f32
    %151 = vector.broadcast %cst_49 : f32 to vector<8x256xf32>
    %152 = arith.maximumf %150, %151 : vector<8x256xf32>
    %153 = arith.addf %152, %92 : vector<8x256xf32>
    %c4 = arith.constant 4 : index
    %c0_50 = arith.constant 0 : index
    %c0_51 = arith.constant 0 : index
    %154 = vector.load %arg1[%c4, %c0_50, %c0_51] : memref<6x256x256xf32, #tpu.memory_space<vmem>>, vector<1x256x256xf32>
    %155 = vector.shape_cast %154 : vector<1x256x256xf32> to vector<256x256xf32>
    %cst_52 = arith.constant dense<0.000000e+00> : vector<8x256xf32>
    %156 = tpu.matmul %153, %155, %cst_52 {dimension_numbers = #tpu.dot_dimension_numbers<[1], [0], [0], [1], [0, 0, 1, 1], [], []>} : vector<8x256xf32>, vector<256x256xf32>, vector<8x256xf32> -> vector<8x256xf32>
    %cst_53 = arith.constant dense<0.000000e+00> : vector<256xf32>
    %157 = vector.multi_reduction <add>, %156, %cst_53 [0] : vector<8x256xf32> to vector<256xf32>
    %158 = vector.shape_cast %157 : vector<256xf32> to vector<1x256xf32>
    %cst_54 = arith.constant 8.000000e+00 : f32
    %159 = vector.broadcast %cst_54 : f32 to vector<1x256xf32>
    %160 = arith.divf %158, %159 : vector<1x256xf32>
    %161 = arith.mulf %156, %156 : vector<8x256xf32>
    %cst_55 = arith.constant dense<0.000000e+00> : vector<256xf32>
    %162 = vector.multi_reduction <add>, %161, %cst_55 [0] : vector<8x256xf32> to vector<256xf32>
    %163 = vector.shape_cast %162 : vector<256xf32> to vector<1x256xf32>
    %cst_56 = arith.constant 8.000000e+00 : f32
    %164 = vector.broadcast %cst_56 : f32 to vector<1x256xf32>
    %165 = arith.divf %163, %164 : vector<1x256xf32>
    %166 = arith.mulf %160, %160 : vector<1x256xf32>
    %167 = arith.subf %165, %166 : vector<1x256xf32>
    %cst_57 = arith.constant 0.000000e+00 : f32
    %168 = vector.broadcast %cst_57 : f32 to vector<1x256xf32>
    %169 = arith.maximumf %167, %168 : vector<1x256xf32>
    %170 = vector.extract_strided_slice %1 {offsets = [5, 0], sizes = [1, 256], strides = [1, 1]} : vector<16x256xf32> to vector<1x256xf32>
    %cst_58 = arith.constant 9.99999974E-6 : f32
    %171 = vector.broadcast %cst_58 : f32 to vector<1x256xf32>
    %172 = arith.addf %169, %171 : vector<1x256xf32>
    %173 = math.rsqrt %172 : vector<1x256xf32>
    %174 = arith.mulf %170, %173 : vector<1x256xf32>
    %175 = vector.extract_strided_slice %1 {offsets = [12, 0], sizes = [1, 256], strides = [1, 1]} : vector<16x256xf32> to vector<1x256xf32>
    %176 = arith.mulf %160, %174 : vector<1x256xf32>
    %177 = arith.subf %175, %176 : vector<1x256xf32>
    %178 = vector.broadcast %174 : vector<1x256xf32> to vector<8x256xf32>
    %179 = arith.mulf %156, %178 : vector<8x256xf32>
    %180 = vector.broadcast %177 : vector<1x256xf32> to vector<8x256xf32>
    %181 = arith.addf %179, %180 : vector<8x256xf32>
    %cst_59 = arith.constant 0.000000e+00 : f32
    %182 = vector.broadcast %cst_59 : f32 to vector<8x256xf32>
    %183 = arith.maximumf %181, %182 : vector<8x256xf32>
    %184 = arith.addf %183, %62 : vector<8x256xf32>
    %c5 = arith.constant 5 : index
    %c0_60 = arith.constant 0 : index
    %c0_61 = arith.constant 0 : index
    %185 = vector.load %arg1[%c5, %c0_60, %c0_61] : memref<6x256x256xf32, #tpu.memory_space<vmem>>, vector<1x256x256xf32>
    %186 = vector.shape_cast %185 : vector<1x256x256xf32> to vector<256x256xf32>
    %cst_62 = arith.constant dense<0.000000e+00> : vector<8x256xf32>
    %187 = tpu.matmul %184, %186, %cst_62 {dimension_numbers = #tpu.dot_dimension_numbers<[1], [0], [0], [1], [0, 0, 1, 1], [], []>} : vector<8x256xf32>, vector<256x256xf32>, vector<8x256xf32> -> vector<8x256xf32>
    %cst_63 = arith.constant dense<0.000000e+00> : vector<256xf32>
    %188 = vector.multi_reduction <add>, %187, %cst_63 [0] : vector<8x256xf32> to vector<256xf32>
    %189 = vector.shape_cast %188 : vector<256xf32> to vector<1x256xf32>
    %cst_64 = arith.constant 8.000000e+00 : f32
    %190 = vector.broadcast %cst_64 : f32 to vector<1x256xf32>
    %191 = arith.divf %189, %190 : vector<1x256xf32>
    %192 = arith.mulf %187, %187 : vector<8x256xf32>
    %cst_65 = arith.constant dense<0.000000e+00> : vector<256xf32>
    %193 = vector.multi_reduction <add>, %192, %cst_65 [0] : vector<8x256xf32> to vector<256xf32>
    %194 = vector.shape_cast %193 : vector<256xf32> to vector<1x256xf32>
    %cst_66 = arith.constant 8.000000e+00 : f32
    %195 = vector.broadcast %cst_66 : f32 to vector<1x256xf32>
    %196 = arith.divf %194, %195 : vector<1x256xf32>
    %197 = arith.mulf %191, %191 : vector<1x256xf32>
    %198 = arith.subf %196, %197 : vector<1x256xf32>
    %cst_67 = arith.constant 0.000000e+00 : f32
    %199 = vector.broadcast %cst_67 : f32 to vector<1x256xf32>
    %200 = arith.maximumf %198, %199 : vector<1x256xf32>
    %201 = vector.extract_strided_slice %1 {offsets = [6, 0], sizes = [1, 256], strides = [1, 1]} : vector<16x256xf32> to vector<1x256xf32>
    %cst_68 = arith.constant 9.99999974E-6 : f32
    %202 = vector.broadcast %cst_68 : f32 to vector<1x256xf32>
    %203 = arith.addf %200, %202 : vector<1x256xf32>
    %204 = math.rsqrt %203 : vector<1x256xf32>
    %205 = arith.mulf %201, %204 : vector<1x256xf32>
    %206 = vector.extract_strided_slice %1 {offsets = [13, 0], sizes = [1, 256], strides = [1, 1]} : vector<16x256xf32> to vector<1x256xf32>
    %207 = arith.mulf %191, %205 : vector<1x256xf32>
    %208 = arith.subf %206, %207 : vector<1x256xf32>
    %209 = vector.broadcast %205 : vector<1x256xf32> to vector<8x256xf32>
    %210 = arith.mulf %187, %209 : vector<8x256xf32>
    %211 = vector.broadcast %208 : vector<1x256xf32> to vector<8x256xf32>
    %212 = arith.addf %210, %211 : vector<8x256xf32>
    %cst_69 = arith.constant 0.000000e+00 : f32
    %213 = vector.broadcast %cst_69 : f32 to vector<8x256xf32>
    %214 = arith.maximumf %212, %213 : vector<8x256xf32>
    %215 = arith.addf %214, %32 : vector<8x256xf32>
    %216 = vector.extract_strided_slice %1 {offsets = [15, 0], sizes = [1, 256], strides = [1, 1]} : vector<16x256xf32> to vector<1x256xf32>
    %217 = vector.broadcast %216 : vector<1x256xf32> to vector<8x256xf32>
    %218 = arith.mulf %215, %217 : vector<8x256xf32>
    %cst_70 = arith.constant dense<0.000000e+00> : vector<8xf32>
    %219 = vector.multi_reduction <add>, %218, %cst_70 [1] : vector<8x256xf32> to vector<8xf32>
    %220 = vector.shape_cast %219 : vector<8xf32> to vector<8x1xf32>
    %c0_71 = arith.constant 0 : index
    %221 = memref.load %arg3[%c0_71] : memref<1xf32, #tpu.memory_space<smem>>
    %222 = vector.broadcast %221 : f32 to vector<8x1xf32>
    %223 = arith.addf %220, %222 : vector<8x1xf32>
    %c0_72 = arith.constant 0 : index
    %c0_73 = arith.constant 0 : index
    %224 = vector.load %arg4[%c0_72, %c0_73] : memref<8x1xf32, #tpu.memory_space<vmem>>, vector<8x1xf32>
    tpu.vector_store %arg4[%c0_72, %c0_73], %223 {strides = array<i32>} : memref<8x1xf32, #tpu.memory_space<vmem>>, vector<8x1xf32>,
    return
  }
}

</mosaic_0001>

<bundles_post_ra>
// kernel: tpu_custom_call.1
= control target key start
LH: loop header
LB: loop body
LE: loop exit
PB: predicated region body
PF: predicated region fallthrough
CT: control target
= control target key end

     0   :  { %10 = vsyncpa [#allocation4], 0  ;;  %s2111_s0 = inlined_call_operand.vmem [shape: f32[8,1], index: 0, kind: input, shape index: {}]   ;;  %s2112_s1 = inlined_call_operand.hbm [shape: f32[6,256,256], index: 1, kind: input, shape index: {}]   ;;  %s2113_s2 = inlined_call_operand.hbm [shape: f32[16,256], index: 2, kind: input, shape index: {}]   ;;  %s2114_s3 = inlined_call_operand.<no memory space> [shape: f32[1], index: 3, kind: input, shape index: {}]   ;;  %s2115_s4 = inlined_call_operand.vmem [shape: f32[8,1], index: 4, kind: output, shape index: {}]  }
   0x1   :  { %11 = vsyncpa [#allocation6], 0  ;;  %s1900_s15 = smov [#allocation3]   ;;  %s1852_s19 = scalar_lea.hbm %s2112_s1, 49152 }
   0x2   :  { %s19_s16 = sshll.u32 %s1900_s15, 4  ;;  %p1853_p0 = scmp.ne.s32.totalorder %s2112_s1, %s1852_s19  ;;  %s20_s16 = int_to_ptr.vmem [resolvable:$true] %s19_s16 }
   0x3   :  { %p1856_p1 = scmp.lt.u32.totalorder %s1852_s19, %s2112_s1 }
   0x5   :  { %p1858_p2 = pnand %p1856_p1, %p1853_p0 }
   0x7   :  { %1861 = shalt.err (!%p1858_p2)
}
   0x8   :  { %s1862_s24 = scalar_lea.vmem %s20_s16, 49152  ;;  %p1867_p4 = scmp.lt.s32.totalorder %s20_s16, %s20_s16 }
   0x9   :  { %p1863_p3 = scmp.ne.s32.totalorder %s20_s16, %s1862_s24  ;;  %p1868_p5 = scmp.lt.s32.totalorder %s1862_s24, %s1862_s24 }
   0xb   :  { %p1869_p6 = por %p1868_p5, %p1867_p4 }
   0xd   :  { %p1870_p7 = pnand %p1869_p6, %p1863_p3 }
   0xf   :  { %1873 = shalt.err (!%p1870_p7)
}
  0x10   :  { %s1901_s25 = smov 256   ;;  %s1902_s26 = smov 16  }
  0x11   :  { %25 = dma.hbm_to_vmem [thread:$0]  %s2112_s1, 49152, %s20_s16, [#allocation4], %s1901_s25, %s1901_s25, %s1902_s26  }
  0x12   :  { %s1903_s29 = smov [#allocation5]   ;;  %s1874_s7 = scalar_lea.hbm %s2113_s2, 512 }
  0x13   :  { %s31_s30 = sshll.u32 %s1903_s29, 4  ;;  %p1875_p8 = scmp.ne.s32.totalorder %s2113_s2, %s1874_s7  ;;  %s32_s30 = int_to_ptr.vmem [resolvable:$true] %s31_s30 }
  0x14   :  { %p1878_p9 = scmp.lt.u32.totalorder %s1874_s7, %s2113_s2 }
  0x16   :  { %p1880_p10 = pnand %p1878_p9, %p1875_p8 }
  0x18   :  { %1883 = shalt.err (!%p1880_p10)
}
  0x19   :  { %s1884_s12 = scalar_lea.vmem %s32_s30, 512  ;;  %p1889_p12 = scmp.lt.s32.totalorder %s32_s30, %s32_s30 }
  0x1a   :  { %p1885_p11 = scmp.ne.s32.totalorder %s32_s30, %s1884_s12  ;;  %p1890_p13 = scmp.lt.s32.totalorder %s1884_s12, %s1884_s12 }
  0x1c   :  { %p1891_p0 = por %p1890_p13, %p1889_p12 }
  0x1e   :  { %p1892_p1 = pnand %p1891_p0, %p1885_p11 }
  0x20   :  { %1895 = shalt.err (!%p1892_p1)
}
  0x21   :  { %37 = dma.hbm_to_vmem [thread:$0]  %s2113_s2, 512, %s32_s30, [#allocation6], %s1901_s25, %s1901_s25, %s1902_s26  }
  0x22   :  { %1896 = dma.done.wait [#allocation4], 49152  }
  0x23   :  { %1897 = vsyncadd [#allocation4], 4294918144 }
  0x24   :  { %1898 = dma.done.wait [#allocation6], 512  }
  0x25   :  { %1899 = vsyncadd [#allocation6], 4294966784  ;;  %v1904_v0 = vmov 0   ;;  %v46_v1 = vld [vmem:[%s2111_s0] sm:$0xff]  ;;  %v142_v2 = vld [vmem:[#allocation3 + $0x8] sm:$0xff]  ;;  %vm1422_vm0 = vcmask 7168  }
  0x26   :  { %1819 = vset.pattern.permute.xlu0 %v1904_v0  ;;  %v144_v3 = vld [vmem:[#allocation3 + $0x18] sm:$0xff]  ;;  %v141_v5 = vld [vmem:[#allocation3] sm:$0xff]  ;;  %v143_v6 = vld [vmem:[#allocation3 + $0x10] sm:$0xff] }
  0x27   :  { %53 = vperm.xlu0 %1819, %v46_v1   ;;  %v1430_v4 = vpack.c.bf16 %v144_v3, %v142_v2  ;;  %v146_v7 = vld [vmem:[#allocation3 + $0x28] sm:$0xff]  ;;  %v1432_v8 = vpack.c.bf16 %v143_v6, %v141_v5  ;;  %v148_v9 = vld [vmem:[#allocation3 + $0x38] sm:$0xff]  ;;  %v145_v10 = vld [vmem:[#allocation3 + $0x20] sm:$0xff] }
  0x28   :  { %v147_v11 = vld [vmem:[#allocation3 + $0x30] sm:$0xff]  ;;  %v1434_v12 = vpack.c.bf16 %v148_v9, %v146_v7  ;;  %v150_v13 = vld [vmem:[#allocation3 + $0x48] sm:$0xff]  ;;  %v152_v14 = vld [vmem:[#allocation3 + $0x58] sm:$0xff] }
  0x29   :  { %1431 = vmatprep.subr.bf16.mxu0 %v1430_v4  ;;  %v1436_v15 = vpack.c.bf16 %v147_v11, %v145_v10  ;;  %v1438_v16 = vpack.c.bf16 %v152_v14, %v150_v13  ;;  %v149_v17 = vld [vmem:[#allocation3 + $0x40] sm:$0xff]  ;;  %v151_v18 = vld [vmem:[#allocation3 + $0x50] sm:$0xff]  ;;  %v154_v19 = vld [vmem:[#allocation3 + $0x68] sm:$0xff] }
  0x2a   :  { %1433 = vmatpush1.bf16.msra.mxu0 %v1432_v8  ;;  %v156_v20 = vld [vmem:[#allocation3 + $0x78] sm:$0xff]  ;;  %v1440_v21 = vpack.c.bf16 %v151_v18, %v149_v17  ;;  %v153_v23 = vld [vmem:[#allocation3 + $0x60] sm:$0xff]  ;;  %v155_v24 = vld [vmem:[#allocation3 + $0x70] sm:$0xff] }
  0x2b   :  { %1435 = vmatprep.subr.bf16.mxu0 %v1434_v12  ;;  %v1442_v22 = vpack.c.bf16 %v156_v20, %v154_v19  ;;  %v158_v25 = vld [vmem:[#allocation3 + $0x88] sm:$0xff]  ;;  %v160_v26 = vld [vmem:[#allocation3 + $0x98] sm:$0xff]  ;;  %v1444_v27 = vpack.c.bf16 %v155_v24, %v153_v23  ;;  %v157_v29 = vld [vmem:[#allocation3 + $0x80] sm:$0xff] }
  0x2c   :  { %v1446_v28 = vpack.c.bf16 %v160_v26, %v158_v25  ;;  %v159_v30 = vld [vmem:[#allocation3 + $0x90] sm:$0xff]  ;;  %v162_v31 = vld [vmem:[#allocation3 + $0xa8] sm:$0xff]  ;;  %v164_v32 = vld [vmem:[#allocation3 + $0xb8] sm:$0xff] }
  0x2d   :  { %v1448_v33 = vpack.c.bf16 %v159_v30, %v157_v29  ;;  %v1450_v34 = vpack.c.bf16 %v164_v32, %v162_v31  ;;  %v161_v35 = vld [vmem:[#allocation3 + $0xa0] sm:$0xff]  ;;  %v163_v36 = vld [vmem:[#allocation3 + $0xb0] sm:$0xff]  ;;  %v166_v37 = vld [vmem:[#allocation3 + $0xc8] sm:$0xff] }
  0x2e   :  { %1437 = vmatpush1.bf16.msra.mxu0 %v1436_v15  ;;  %v168_v38 = vld [vmem:[#allocation3 + $0xd8] sm:$0xff]  ;;  %v1452_v39 = vpack.c.bf16 %v163_v36, %v161_v35  ;;  %v165_v41 = vld [vmem:[#allocation3 + $0xc0] sm:$0xff]  ;;  %v167_v42 = vld [vmem:[#allocation3 + $0xd0] sm:$0xff] }
  0x2f   :  { %1439 = vmatprep.subr.bf16.mxu0 %v1438_v16  ;;  %v1454_v40 = vpack.c.bf16 %v168_v38, %v166_v37  ;;  %v170_v43 = vld [vmem:[#allocation3 + $0xe8] sm:$0xff]  ;;  %v172_v44 = vld [vmem:[#allocation3 + $0xf8] sm:$0xff]  ;;  %v1456_v45 = vpack.c.bf16 %v167_v42, %v165_v41  ;;  %v169_v47 = vld [vmem:[#allocation3 + $0xe0] sm:$0xff] }
  0x30   :  { %v1458_v46 = vpack.c.bf16 %v172_v44, %v170_v43  ;;  %v171_v48 = vld [vmem:[#allocation3 + $0xf0] sm:$0xff]  ;;  %v174_v49 = vld [vmem:[#allocation3 + $0x108] sm:$0xff]  ;;  %v176_v50 = vld [vmem:[#allocation3 + $0x118] sm:$0xff] }
  0x31   :  { %v1460_v51 = vpack.c.bf16 %v171_v48, %v169_v47  ;;  %v1462_v52 = vpack.c.bf16 %v176_v50, %v174_v49  ;;  %v173_v53 = vld [vmem:[#allocation3 + $0x100] sm:$0xff]  ;;  %v175_v54 = vld [vmem:[#allocation3 + $0x110] sm:$0xff]  ;;  %v178_v55 = vld [vmem:[#allocation3 + $0x128] sm:$0xff] }
  0x32   :  { %1441 = vmatpush1.bf16.msra.mxu0 %v1440_v21  ;;  %v180_v56 = vld [vmem:[#allocation3 + $0x138] sm:$0xff]  ;;  %v1464_v57 = vpack.c.bf16 %v175_v54, %v173_v53  ;;  %v177_v59 = vld [vmem:[#allocation3 + $0x120] sm:$0xff]  ;;  %v179_v60 = vld [vmem:[#allocation3 + $0x130] sm:$0xff] }
  0x33   :  { %1443 = vmatprep.subr.bf16.mxu0 %v1442_v22  ;;  %v1466_v58 = vpack.c.bf16 %v180_v56, %v178_v55  ;;  %v182_v61 = vld [vmem:[#allocation3 + $0x148] sm:$0xff]  ;;  %v184_v62 = vld [vmem:[#allocation3 + $0x158] sm:$0xff]  ;;  %v1468_v63 = vpack.c.bf16 %v179_v60, %v177_v59  ;;  %v181_v1 = vld [vmem:[#allocation3 + $0x140] sm:$0xff] }
  0x34   :  { %v1470_v0 = vpack.c.bf16 %v184_v62, %v182_v61  ;;  %v183_v2 = vld [vmem:[#allocation3 + $0x150] sm:$0xff]  ;;  %v186_v3 = vld [vmem:[#allocation3 + $0x168] sm:$0xff]  ;;  %v188_v4 = vld [vmem:[#allocation3 + $0x178] sm:$0xff] }
  0x35   :  { %v1472_v5 = vpack.c.bf16 %v183_v2, %v181_v1  ;;  %v1474_v6 = vpack.c.bf16 %v188_v4, %v186_v3  ;;  %v185_v7 = vld [vmem:[#allocation3 + $0x160] sm:$0xff]  ;;  %v187_v8 = vld [vmem:[#allocation3 + $0x170] sm:$0xff]  ;;  %v190_v9 = vld [vmem:[#allocation3 + $0x188] sm:$0xff] }
  0x36   :  { %1445 = vmatpush1.bf16.msra.mxu0 %v1444_v27  ;;  %v192_v10 = vld [vmem:[#allocation3 + $0x198] sm:$0xff]  ;;  %v1476_v11 = vpack.c.bf16 %v187_v8, %v185_v7  ;;  %v189_v13 = vld [vmem:[#allocation3 + $0x180] sm:$0xff]  ;;  %v191_v14 = vld [vmem:[#allocation3 + $0x190] sm:$0xff] }
  0x37   :  { %1447 = vmatprep.subr.bf16.mxu0 %v1446_v28  ;;  %v1478_v12 = vpack.c.bf16 %v192_v10, %v190_v9  ;;  %v194_v15 = vld [vmem:[#allocation3 + $0x1a8] sm:$0xff]  ;;  %v196_v16 = vld [vmem:[#allocation3 + $0x1b8] sm:$0xff]  ;;  %v1480_v17 = vpack.c.bf16 %v191_v14, %v189_v13  ;;  %v193_v19 = vld [vmem:[#allocation3 + $0x1a0] sm:$0xff] }
  0x38   :  { %v1482_v18 = vpack.c.bf16 %v196_v16, %v194_v15  ;;  %v195_v20 = vld [vmem:[#allocation3 + $0x1b0] sm:$0xff]  ;;  %v198_v21 = vld [vmem:[#allocation3 + $0x1c8] sm:$0xff]  ;;  %v200_v22 = vld [vmem:[#allocation3 + $0x1d8] sm:$0xff] }
  0x39   :  { %v197_v23 = vld [vmem:[#allocation3 + $0x1c0] sm:$0xff]  ;;  %v199_v24 = vld [vmem:[#allocation3 + $0x1d0] sm:$0xff]  ;;  %v352_v25 = vld [vmem:[#allocation3 + $0x208] sm:$0xff]  ;;  %v1484_v28 = vpack.c.bf16 %v195_v20, %v193_v19 }
  0x3a   :  { %1449 = vmatpush1.bf16.msra.mxu0 %v1448_v33  ;;  %v354_v26 = vld [vmem:[#allocation3 + $0x218] sm:$0xff]  ;;  %v351_v27 = vld [vmem:[#allocation3 + $0x200] sm:$0xff]  ;;  %v353_v30 = vld [vmem:[#allocation3 + $0x210] sm:$0xff]  ;;  %v1486_v33 = vpack.c.bf16 %v200_v22, %v198_v21  ;;  %v1488_v43 = vpack.c.bf16 %v199_v24, %v197_v23 }
  0x3b   :  { %1451 = vmatprep.subr.bf16.mxu0 %v1450_v34  ;;  %v1494_v29 = vpack.c.bf16 %v354_v26, %v352_v25  ;;  %v356_v31 = vld [vmem:[#allocation3 + $0x228] sm:$0xff]  ;;  %v358_v32 = vld [vmem:[#allocation3 + $0x238] sm:$0xff]  ;;  %v1496_v34 = vpack.c.bf16 %v353_v30, %v351_v27  ;;  %v355_v36 = vld [vmem:[#allocation3 + $0x220] sm:$0xff] }
  0x3c   :  { %v1498_v35 = vpack.c.bf16 %v358_v32, %v356_v31  ;;  %v357_v37 = vld [vmem:[#allocation3 + $0x230] sm:$0xff]  ;;  %v360_v38 = vld [vmem:[#allocation3 + $0x248] sm:$0xff]  ;;  %v362_v41 = vld [vmem:[#allocation3 + $0x258] sm:$0xff] }
  0x3d   :  { %1495 = vmatprep.subr.bf16.mxu1 %v1494_v29  ;;  %v1500_v42 = vpack.c.bf16 %v357_v37, %v355_v36  ;;  %v201_v44 = vld [vmem:[#allocation3 + $0x1e0] sm:$0xff]  ;;  %v361_v47 = vld [vmem:[#allocation3 + $0x250] sm:$0xff]  ;;  %v364_v50 = vld [vmem:[#allocation3 + $0x268] sm:$0xff] }
  0x3e   :  { %1453 = vmatpush1.bf16.msra.mxu0 %v1452_v39  ;;  %v202_v39 = vld [vmem:[#allocation3 + $0x1e8] sm:$0xff]  ;;  %1497 = vmatpush1.bf16.msra.mxu1 %v1496_v34  ;;  %v203_v49 = vld [vmem:[#allocation3 + $0x1f0] sm:$0xff]  ;;  %v363_v55 = vld [vmem:[#allocation3 + $0x260] sm:$0xff] }
  0x3f   :  { %1455 = vmatprep.subr.bf16.mxu0 %v1454_v40  ;;  %v204_v40 = vld [vmem:[#allocation3 + $0x1f8] sm:$0xff]  ;;  %1499 = vmatprep.subr.bf16.mxu1 %v1498_v35  ;;  %v1492_v53 = vpack.c.bf16 %v203_v49, %v201_v44  ;;  %v365_v56 = vld [vmem:[#allocation3 + $0x270] sm:$0xff] }
  0x40   :  { %v1490_v48 = vpack.c.bf16 %v204_v40, %v202_v39  ;;  %v1962_v61 = vld [vmem:[#allocation5 + $0x10] sm:$0xff]  ;;  %v1964_v62 = vld [vmem:[#allocation5 + $0x18] sm:$0xff] }
  0x42   :  { %1457 = vmatpush1.bf16.msra.mxu0 %v1456_v45  ;;  %v1502_v45 = vpack.c.bf16 %v362_v41, %v360_v38  ;;  %1501 = vmatpush1.bf16.msra.mxu1 %v1500_v42  ;;  %v1970_v42 = vld [vmem:[#allocation5 + $0x8] sm:$0xff] }
  0x43   :  { %1459 = vmatprep.subr.bf16.mxu0 %v1458_v46  ;;  %v359_v46 = vld [vmem:[#allocation3 + $0x240] sm:$0xff] }
  0x44   :  { %1503 = vmatprep.subr.bf16.mxu1 %v1502_v45 }
  0x46   :  { %1461 = vmatpush1.bf16.msra.mxu0 %v1460_v51  ;;  %v366_v51 = vld [vmem:[#allocation3 + $0x278] sm:$0xff] }
  0x47   :  { %1463 = vmatprep.subr.bf16.mxu0 %v1462_v52  ;;  %v1504_v52 = vpack.c.bf16 %v361_v47, %v359_v46  ;;  %v1506_v54 = vpack.c.bf16 %v366_v51, %v364_v50 }
  0x49   :  { %1505 = vmatpush1.bf16.msra.mxu1 %v1504_v52 }
  0x4a   :  { %1465 = vmatpush1.bf16.msra.mxu0 %v1464_v57  ;;  %v1508_v57 = vpack.c.bf16 %v365_v56, %v363_v55  ;;  %1507 = vmatprep.subr.bf16.mxu1 %v1506_v54 }
  0x4b   :  { %1467 = vmatprep.subr.bf16.mxu0 %v1466_v58  ;;  %v56_v58 = vlaneseq }
  0x4d   :  { %1509 = vmatpush1.bf16.msra.mxu1 %v1508_v57  ;;  %v1957_v59 = vshrl.u32 %v56_v58, 7 }
  0x4e   :  { %1469 = vmatpush1.bf16.msra.mxu0 %v1468_v63 }
  0x4f   :  { %1471 = vmatprep.subr.bf16.mxu0 %v1470_v0  ;;  %v1960_v60 = vsub.s32 6, %v1957_v59  ;;  %v1976_v47 = vsub.s32 0, %v1957_v59 }
  0x51   :  { %v59_v63 = vrot.slane %v1962_v61, %v1960_v60  ;;  %v63_v0 = vrot.slane %v1964_v62, %v1960_v60 }
  0x52   :  { %1473 = vmatpush1.bf16.msra.mxu0 %v1472_v5 }
  0x53   :  { %1475 = vmatprep.subr.bf16.mxu0 %v1474_v6 }
  0x56   :  { %1477 = vmatpush1.bf16.msra.mxu0 %v1476_v11 }
  0x57   :  { %1479 = vmatprep.subr.bf16.mxu0 %v1478_v12 }
  0x5a   :  { %1481 = vmatpush1.bf16.msra.mxu0 %v1480_v17 }
  0x5b   :  { %1483 = vmatprep.subr.bf16.mxu0 %v1482_v18 }
  0x5e   :  { %1485 = vmatpush1.bf16.msra.mxu0 %v1484_v28 }
  0x5f   :  { %1487 = vmatprep.subr.bf16.mxu0 %v1486_v33 }
  0x62   :  { %1489 = vmatpush1.bf16.msra.mxu0 %v1488_v43  ;;  %v1972_v43 = vld [vmem:[#allocation5] sm:$0xff] }
  0x63   :  { %1491 = vmatprep.subr.bf16.mxu0 %v1490_v48 }
  0x66   :  { %1493 = vmatpush1.bf16.msra.mxu0 %v1492_v53  ;;  %v1981_v53 = vsub.s32 7, %v1957_v59 }
  0xa6   :  { %v54_v1 = vpop.permute.xlu0 %53 }
  0xa7   :  { %v64_v2 = vmul.f32 %v59_v63, %v54_v1  ;;  %v65_v3 = vmul.f32 %v63_v0, %v54_v1 }
  0xa9   :  { %v66_v4 = vrot.slane %v64_v2, 4  ;;  %v72_v5 = vrot.slane %v65_v3, 4  ;;  %v81_v6 = vmul.f32 %v64_v2, %v64_v2  ;;  %v82_v7 = vmul.f32 %v65_v3, %v65_v3 }
  0xab   :  { %v67_v8 = vadd.f32 %v66_v4, %v64_v2  ;;  %v73_v9 = vadd.f32 %v72_v5, %v65_v3  ;;  %v83_v10 = vrot.slane %v81_v6, 4  ;;  %v89_v11 = vrot.slane %v82_v7, 4 }
  0xad   :  { %v68_v12 = vrot.slane %v67_v8, 2  ;;  %v74_v13 = vrot.slane %v73_v9, 2  ;;  %v84_v14 = vadd.f32 %v83_v10, %v81_v6  ;;  %v90_v15 = vadd.f32 %v89_v11, %v82_v7  ;;  %v369_v10 = vld [vmem:[#allocation3 + $0x290] sm:$0xff] }
  0xaf   :  { %v69_v16 = vadd.f32 %v68_v12, %v67_v8  ;;  %v75_v17 = vadd.f32 %v74_v13, %v73_v9  ;;  %v85_v18 = vrot.slane %v84_v14, 2  ;;  %v91_v19 = vrot.slane %v90_v15, 2  ;;  %v370_v8 = vld [vmem:[#allocation3 + $0x298] sm:$0xff]  ;;  %v372_v12 = vld [vmem:[#allocation3 + $0x2a8] sm:$0xff] }
  0xb0   :  { %v374_v13 = vld [vmem:[#allocation3 + $0x2b8] sm:$0xff] }
  0xb1   :  { %v70_v20 = vrot.slane %v69_v16, 1  ;;  %v86_v21 = vadd.f32 %v85_v18, %v84_v14  ;;  %v92_v22 = vadd.f32 %v91_v19, %v90_v15  ;;  %v76_v23 = vrot.slane %v75_v17, 1  ;;  %v371_v15 = vld [vmem:[#allocation3 + $0x2a0] sm:$0xff]  ;;  %v376_v18 = vld [vmem:[#allocation3 + $0x2c8] sm:$0xff]  ;;  %v378_v19 = vld [vmem:[#allocation3 + $0x2d8] sm:$0xff] }
  0xb2   :  { %v1514_v14 = vpack.c.bf16 %v374_v13, %v372_v12  ;;  %v405_v12 = vld [vmem:[#allocation3 + $0x3b0] sm:$0xff] }
  0xb3   :  { %v87_v24 = vrot.slane %v86_v21, 1  ;;  %v93_v25 = vrot.slane %v92_v22, 1  ;;  %v77_v26 = vadd.f32 %v76_v23, %v75_v17  ;;  %v71_v27 = vadd.f32 %v70_v20, %v69_v16  ;;  %v373_v16 = vld [vmem:[#allocation3 + $0x2b0] sm:$0xff] }
  0xb4   :  { %v1516_v17 = vpack.c.bf16 %v373_v16, %v371_v15  ;;  %v1518_v20 = vpack.c.bf16 %v378_v19, %v376_v18  ;;  %v410_v15 = vld [vmem:[#allocation3 + $0x3d8] sm:$0xff]  ;;  %v407_v16 = vld [vmem:[#allocation3 + $0x3c0] sm:$0xff]  ;;  %v409_v18 = vld [vmem:[#allocation3 + $0x3d0] sm:$0xff] }
  0xb5   :  { %v88_v28 = vadd.f32 %v87_v24, %v86_v21  ;;  %v94_v29 = vadd.f32 %v93_v25, %v92_v22  ;;  %v80_v30 = vmul.f32 0.125, %v77_v26  ;;  %v79_v31 = vmul.f32 0.125, %v71_v27  ;;  %v375_v21 = vld [vmem:[#allocation3 + $0x2c0] sm:$0xff]  ;;  %v377_v22 = vld [vmem:[#allocation3 + $0x2d0] sm:$0xff]  ;;  %v380_v24 = vld [vmem:[#allocation3 + $0x2e8] sm:$0xff] }
  0xb6   :  { %v1520_v23 = vpack.c.bf16 %v377_v22, %v375_v21  ;;  %v382_v25 = vld [vmem:[#allocation3 + $0x2f8] sm:$0xff]  ;;  %v379_v27 = vld [vmem:[#allocation3 + $0x2e0] sm:$0xff]  ;;  %v412_v19 = vld [vmem:[#allocation3 + $0x3e8] sm:$0xff]  ;;  %v1552_v21 = vpack.c.bf16 %v409_v18, %v407_v16 }
  0xb7   :  { %v95_v32 = vmul.f32 0.125, %v88_v28  ;;  %v96_v33 = vmul.f32 0.125, %v94_v29  ;;  %v98_v34 = vmul.f32 %v80_v30, %v80_v30  ;;  %v97_v35 = vmul.f32 %v79_v31, %v79_v31  ;;  %v381_v28 = vld [vmem:[#allocation3 + $0x2f0] sm:$0xff] }
  0xb8   :  { %v1522_v26 = vpack.c.bf16 %v382_v25, %v380_v24  ;;  %v1524_v29 = vpack.c.bf16 %v381_v28, %v379_v27  ;;  %v413_v24 = vld [vmem:[#allocation3 + $0x3f0] sm:$0xff]  ;;  %v564_v27 = vld [vmem:[#allocation3 + $0x418] sm:$0xff]  ;;  %v561_v28 = vld [vmem:[#allocation3 + $0x400] sm:$0xff] }
  0xb9   :  { %v100_v36 = vsub.f32 %v96_v33, %v98_v34  ;;  %v99_v37 = vsub.f32 %v95_v32, %v97_v35  ;;  %v383_v33 = vld [vmem:[#allocation3 + $0x300] sm:$0xff]  ;;  %v385_v34 = vld [vmem:[#allocation3 + $0x310] sm:$0xff] }
  0xba   :  { %v1528_v35 = vpack.c.bf16 %v385_v34, %v383_v33 }
  0xbb   :  { %v102_v38 = vmax.f32 %v100_v36, 0.0  ;;  %v101_v39 = vmax.f32 %v99_v37, 0.0  ;;  %v388_v36 = vld [vmem:[#allocation3 + $0x328] sm:$0xff]  ;;  %v390_v37 = vld [vmem:[#allocation3 + $0x338] sm:$0xff] }
  0xbd   :  { %v104_v40 = vadd.f32 1e-05, %v102_v38  ;;  %v103_v41 = vadd.f32 1e-05, %v101_v39  ;;  %v1530_v38 = vpack.c.bf16 %v390_v37, %v388_v36  ;;  %v387_v39 = vld [vmem:[#allocation3 + $0x320] sm:$0xff]  ;;  %v567_v36 = vld [vmem:[#allocation3 + $0x430] sm:$0xff] }
  0xbe   :  { %v570_v37 = vld [vmem:[#allocation3 + $0x448] sm:$0xff] }
  0xbf   :  { %1820 = vrsqrt.f32 %v104_v40  ;;  %v389_v40 = vld [vmem:[#allocation3 + $0x330] sm:$0xff] }
  0xc0   :  { %1822 = vrsqrt.f32 %v103_v41  ;;  %v1532_v41 = vpack.c.bf16 %v389_v40, %v387_v39 }
  0xc9   :  { %v1821_v44 = vpop.eup %1820 }
  0xca   :  { %v1823_v45 = vpop.eup %1822  ;;  %v108_v46 = vmul.f32 %v1821_v44, %v1970_v42  ;;  %v392_v44 = vld [vmem:[#allocation3 + $0x348] sm:$0xff] }
  0xcb   :  { %v107_v48 = vmul.f32 %v1823_v45, %v1972_v43  ;;  %v394_v45 = vld [vmem:[#allocation3 + $0x358] sm:$0xff] }
  0xcc   :  { %v110_v49 = vmul.f32 %v108_v46, %v80_v30  ;;  %v126_v52 = vrot.slane %v108_v46, %v1976_v47  ;;  %v384_v30 = vld [vmem:[#allocation3 + $0x308] sm:$0xff]  ;;  %v1534_v46 = vpack.c.bf16 %v394_v45, %v392_v44  ;;  %v571_v44 = vld [vmem:[#allocation3 + $0x450] sm:$0xff] }
  0xcd   :  { %v109_v50 = vmul.f32 %v107_v48, %v79_v31  ;;  %v122_v55 = vrot.slane %v107_v48, %v1976_v47  ;;  %v386_v31 = vld [vmem:[#allocation3 + $0x318] sm:$0xff]  ;;  %v391_v48 = vld [vmem:[#allocation3 + $0x340] sm:$0xff]  ;;  %v574_v45 = vld [vmem:[#allocation3 + $0x468] sm:$0xff] }
  0xce   :  { %v114_v51 = vrot.slane %v110_v49, 1  ;;  %v128_v58 = vmul.f32 %v126_v52, %v65_v3  ;;  %v368_v3 = vld [vmem:[#allocation3 + $0x288] sm:$0xff]  ;;  %v1526_v32 = vpack.c.bf16 %v386_v31, %v384_v30  ;;  %v393_v49 = vld [vmem:[#allocation3 + $0x350] sm:$0xff]  ;;  %v398_v52 = vld [vmem:[#allocation3 + $0x378] sm:$0xff] }
  0xcf   :  { %v113_v54 = vrot.slane %v109_v50, 1  ;;  %v127_v0 = vmul.f32 %v122_v55, %v64_v2  ;;  %v1510_v9 = vpack.c.bf16 %v370_v8, %v368_v3  ;;  %v367_v2 = vld [vmem:[#allocation3 + $0x280] sm:$0xff]  ;;  %v1536_v50 = vpack.c.bf16 %v393_v49, %v391_v48  ;;  %v401_v3 = vld [vmem:[#allocation3 + $0x390] sm:$0xff]  ;;  %v566_v31 = vld [vmem:[#allocation3 + $0x428] sm:$0xff] }
  0xd0   :  { %v118_v56 = vsub.f32 %v1970_v42, %v114_v51  ;;  %v1512_v11 = vpack.c.bf16 %v369_v10, %v367_v2  ;;  %v396_v51 = vld [vmem:[#allocation3 + $0x368] sm:$0xff]  ;;  %v395_v55 = vld [vmem:[#allocation3 + $0x360] sm:$0xff]  ;;  %v406_v2 = vld [vmem:[#allocation3 + $0x3b8] sm:$0xff] }
  0xd1   :  { %v117_v57 = vsub.f32 %v1972_v43, %v113_v54  ;;  %1511 = vmatprep.subr.bf16.mxu1 %v1510_v9  ;;  %v1538_v54 = vpack.c.bf16 %v398_v52, %v396_v51  ;;  %v404_v9 = vld [vmem:[#allocation3 + $0x3a8] sm:$0xff]  ;;  %v563_v30 = vld [vmem:[#allocation3 + $0x410] sm:$0xff] }
  0xd2   :  { %v136_v63 = vrot.slane %v118_v56, %v1981_v53  ;;  %1513 = vmatpush1.bf16.msra.mxu1 %v1512_v11  ;;  %v397_v56 = vld [vmem:[#allocation3 + $0x370] sm:$0xff]  ;;  %v1546_v10 = vpack.c.bf16 %v406_v2, %v404_v9  ;;  %v403_v11 = vld [vmem:[#allocation3 + $0x3a0] sm:$0xff]  ;;  %v1560_v33 = vpack.c.bf16 %v563_v30, %v561_v28 }
  0xd3   :  { %v132_v1 = vrot.slane %v117_v57, %v1981_v53  ;;  %1515 = vmatprep.subr.bf16.mxu1 %v1514_v14  ;;  %v1540_v57 = vpack.c.bf16 %v397_v56, %v395_v55  ;;  %v1548_v13 = vpack.c.bf16 %v405_v12, %v403_v11  ;;  %v408_v14 = vld [vmem:[#allocation3 + $0x3c8] sm:$0xff]  ;;  %v575_v51 = vld [vmem:[#allocation3 + $0x470] sm:$0xff] }
  0xd4   :  { %v1988_v4 = vadd.f32 %v136_v63, %v128_v58  ;;  %v400_v58 = vld [vmem:[#allocation3 + $0x388] sm:$0xff]  ;;  %v402_v63 = vld [vmem:[#allocation3 + $0x398] sm:$0xff] }
  0xd5   :  { %v1990_v5 = vadd.f32 %v132_v1, %v127_v0  ;;  %v1542_v0 = vpack.c.bf16 %v402_v63, %v400_v58  ;;  %v399_v1 = vld [vmem:[#allocation3 + $0x380] sm:$0xff] }
  0xd6   :  { %v140_v6 = vmax.f32 %v1988_v4, 0.0  ;;  %1517 = vmatpush1.bf16.msra.mxu1 %v1516_v17  ;;  %v1544_v8 = vpack.c.bf16 %v401_v3, %v399_v1  ;;  %v1550_v17 = vpack.c.bf16 %v410_v15, %v408_v14 }
  0xd7   :  { %v139_v7 = vmax.f32 %v1990_v5, 0.0  ;;  %1519 = vmatprep.subr.bf16.mxu1 %v1518_v20  ;;  %v414_v20 = vld [vmem:[#allocation3 + $0x3f8] sm:$0xff] }
  0xd8   :  { %269 = vmatprep.mubr.f32.mxu0 %v140_v6  ;;  %v1554_v22 = vpack.c.bf16 %v414_v20, %v412_v19 }
  0xd9   :  { %270 = vmatmul.mubr.f32.vlgmr.msra.gmra.mrb[0].mxu0 %v139_v7 }
  0xda   :  { %1521 = vmatpush1.bf16.msra.mxu1 %v1520_v23  ;;  %v411_v23 = vld [vmem:[#allocation3 + $0x3e0] sm:$0xff] }
  0xdb   :  { %1523 = vmatprep.subr.bf16.mxu1 %v1522_v26  ;;  %v1556_v25 = vpack.c.bf16 %v413_v24, %v411_v23  ;;  %v562_v26 = vld [vmem:[#allocation3 + $0x408] sm:$0xff] }
  0xde   :  { %1525 = vmatpush1.bf16.msra.mxu1 %v1524_v29  ;;  %v1558_v29 = vpack.c.bf16 %v564_v27, %v562_v26 }
  0xdf   :  { %1527 = vmatprep.subr.bf16.mxu1 %v1526_v32  ;;  %v568_v32 = vld [vmem:[#allocation3 + $0x438] sm:$0xff] }
  0xe0   :  { %v1562_v34 = vpack.c.bf16 %v568_v32, %v566_v31  ;;  %1559 = vmatprep.subr.bf16.mxu0 %v1558_v29 }
  0xe1   :  { %1561 = vmatpush1.bf16.msra.mxu0 %v1560_v33 }
  0xe2   :  { %1529 = vmatpush1.bf16.msra.mxu1 %v1528_v35  ;;  %v565_v35 = vld [vmem:[#allocation3 + $0x420] sm:$0xff]  ;;  %1563 = vmatprep.subr.bf16.mxu0 %v1562_v34 }
  0xe3   :  { %1531 = vmatprep.subr.bf16.mxu1 %v1530_v38  ;;  %v572_v38 = vld [vmem:[#allocation3 + $0x458] sm:$0xff]  ;;  %v1564_v39 = vpack.c.bf16 %v567_v36, %v565_v35 }
  0xe4   :  { %v1566_v40 = vpack.c.bf16 %v572_v38, %v570_v37 }
  0xe5   :  { %1565 = vmatpush1.bf16.msra.mxu0 %v1564_v39 }
  0xe6   :  { %1533 = vmatpush1.bf16.msra.mxu1 %v1532_v41  ;;  %v569_v41 = vld [vmem:[#allocation3 + $0x440] sm:$0xff]  ;;  %1567 = vmatprep.subr.bf16.mxu0 %v1566_v40 }
  0xe7   :  { %1535 = vmatprep.subr.bf16.mxu1 %v1534_v46  ;;  %v576_v46 = vld [vmem:[#allocation3 + $0x478] sm:$0xff]  ;;  %v1568_v48 = vpack.c.bf16 %v571_v44, %v569_v41  ;;  %v2000_v41 = vsub.s32 1, %v1957_v59 }
  0xe8   :  { %v1570_v49 = vpack.c.bf16 %v576_v46, %v574_v45 }
  0xe9   :  { %1569 = vmatpush1.bf16.msra.mxu0 %v1568_v48 }
  0xea   :  { %1537 = vmatpush1.bf16.msra.mxu1 %v1536_v50  ;;  %v573_v50 = vld [vmem:[#allocation3 + $0x460] sm:$0xff]  ;;  %1571 = vmatprep.subr.bf16.mxu0 %v1570_v49 }
  0xeb   :  { %1539 = vmatprep.subr.bf16.mxu1 %v1538_v54  ;;  %v1572_v52 = vpack.c.bf16 %v575_v51, %v573_v50 }
  0xed   :  { %1573 = vmatpush1.bf16.msra.mxu0 %v1572_v52 }
  0xee   :  { %1541 = vmatpush1.bf16.msra.mxu1 %v1540_v57 }
  0xef   :  { %1543 = vmatprep.subr.bf16.mxu1 %v1542_v0 }
  0xf2   :  { %1545 = vmatpush1.bf16.msra.mxu1 %v1544_v8 }
  0xf3   :  { %1547 = vmatprep.subr.bf16.mxu1 %v1546_v10 }
  0xf6   :  { %1549 = vmatpush1.bf16.msra.mxu1 %v1548_v13 }
  0xf7   :  { %1551 = vmatprep.subr.bf16.mxu1 %v1550_v17 }
  0xfa   :  { %1553 = vmatpush1.bf16.msra.mxu1 %v1552_v21 }
  0xfb   :  { %1555 = vmatprep.subr.bf16.mxu1 %v1554_v22 }
  0xfe   :  { %1557 = vmatpush1.bf16.msra.mxu1 %v1556_v25 }
 0x1ac   :  { %v271_v54 = vpop.f32.mrb[0].mxu0 }
 0x1ad   :  { %v276_v55 = vrot.slane %v271_v54, 4  ;;  %v290_v56 = vmul.f32 %v271_v54, %v271_v54  ;;  %v273_v57 = vpop.f32.mrb[1].mxu0 }
 0x1ae   :  { %v282_v58 = vrot.slane %v273_v57, 4  ;;  %v291_v63 = vmul.f32 %v273_v57, %v273_v57 }
 0x1af   :  { %v277_v0 = vadd.f32 %v276_v55, %v271_v54  ;;  %v292_v1 = vrot.slane %v290_v56, 4 }
 0x1b0   :  { %v283_v3 = vadd.f32 %v282_v58, %v273_v57  ;;  %v298_v8 = vrot.slane %v291_v63, 4 }
 0x1b1   :  { %v278_v9 = vrot.slane %v277_v0, 2  ;;  %v293_v2 = vadd.f32 %v292_v1, %v290_v56 }
 0x1b2   :  { %v284_v10 = vrot.slane %v283_v3, 2  ;;  %v299_v11 = vadd.f32 %v298_v8, %v291_v63 }
 0x1b3   :  { %v279_v12 = vadd.f32 %v278_v9, %v277_v0  ;;  %v294_v13 = vrot.slane %v293_v2, 2 }
 0x1b4   :  { %v285_v14 = vadd.f32 %v284_v10, %v283_v3  ;;  %v300_v15 = vrot.slane %v299_v11, 2 }
 0x1b5   :  { %v280_v16 = vrot.slane %v279_v12, 1  ;;  %v295_v17 = vadd.f32 %v294_v13, %v293_v2  ;;  %v580_v2 = vld [vmem:[#allocation3 + $0x498] sm:$0xff] }
 0x1b6   :  { %v286_v18 = vrot.slane %v285_v14, 1  ;;  %v301_v19 = vadd.f32 %v300_v15, %v299_v11  ;;  %v579_v11 = vld [vmem:[#allocation3 + $0x490] sm:$0xff]  ;;  %v584_v13 = vld [vmem:[#allocation3 + $0x4b8] sm:$0xff]  ;;  %v581_v15 = vld [vmem:[#allocation3 + $0x4a0] sm:$0xff] }
 0x1b7   :  { %v281_v20 = vadd.f32 %v280_v16, %v279_v12  ;;  %v296_v21 = vrot.slane %v295_v17, 1  ;;  %v582_v12 = vld [vmem:[#allocation3 + $0x4a8] sm:$0xff]  ;;  %v583_v16 = vld [vmem:[#allocation3 + $0x4b0] sm:$0xff] }
 0x1b8   :  { %v287_v22 = vadd.f32 %v286_v18, %v285_v14  ;;  %v302_v23 = vrot.slane %v301_v19, 1  ;;  %v1578_v14 = vpack.c.bf16 %v584_v13, %v582_v12  ;;  %v586_v18 = vld [vmem:[#allocation3 + $0x4c8] sm:$0xff]  ;;  %v616_v13 = vld [vmem:[#allocation3 + $0x5b8] sm:$0xff] }
 0x1b9   :  { %v288_v24 = vmul.f32 0.125, %v281_v20  ;;  %v297_v25 = vadd.f32 %v296_v21, %v295_v17  ;;  %v1580_v17 = vpack.c.bf16 %v583_v16, %v581_v15  ;;  %v585_v21 = vld [vmem:[#allocation3 + $0x4c0] sm:$0xff]  ;;  %v614_v12 = vld [vmem:[#allocation3 + $0x5a8] sm:$0xff]  ;;  %v615_v16 = vld [vmem:[#allocation3 + $0x5b0] sm:$0xff] }
 0x1ba   :  { %v289_v26 = vmul.f32 0.125, %v287_v22  ;;  %v303_v27 = vadd.f32 %v302_v23, %v301_v19  ;;  %v588_v19 = vld [vmem:[#allocation3 + $0x4d8] sm:$0xff]  ;;  %v587_v22 = vld [vmem:[#allocation3 + $0x4d0] sm:$0xff]  ;;  %v613_v15 = vld [vmem:[#allocation3 + $0x5a0] sm:$0xff] }
 0x1bb   :  { %v304_v28 = vmul.f32 0.125, %v297_v25  ;;  %v306_v29 = vmul.f32 %v288_v24, %v288_v24  ;;  %v1582_v20 = vpack.c.bf16 %v588_v19, %v586_v18  ;;  %v1584_v23 = vpack.c.bf16 %v587_v22, %v585_v21  ;;  %v592_v25 = vld [vmem:[#allocation3 + $0x4f8] sm:$0xff]  ;;  %v618_v18 = vld [vmem:[#allocation3 + $0x5c8] sm:$0xff]  ;;  %v617_v21 = vld [vmem:[#allocation3 + $0x5c0] sm:$0xff] }
 0x1bc   :  { %v305_v30 = vmul.f32 0.125, %v303_v27  ;;  %v307_v31 = vmul.f32 %v289_v26, %v289_v26  ;;  %v589_v27 = vld [vmem:[#allocation3 + $0x4e0] sm:$0xff]  ;;  %v620_v19 = vld [vmem:[#allocation3 + $0x5d8] sm:$0xff]  ;;  %v619_v22 = vld [vmem:[#allocation3 + $0x5d0] sm:$0xff] }
 0x1bd   :  { %v308_v32 = vsub.f32 %v304_v28, %v306_v29  ;;  %v591_v28 = vld [vmem:[#allocation3 + $0x4f0] sm:$0xff] }
 0x1be   :  { %v309_v33 = vsub.f32 %v305_v30, %v307_v31  ;;  %v1588_v29 = vpack.c.bf16 %v591_v28, %v589_v27  ;;  %v594_v30 = vld [vmem:[#allocation3 + $0x508] sm:$0xff]  ;;  %v596_v31 = vld [vmem:[#allocation3 + $0x518] sm:$0xff]  ;;  %v623_v28 = vld [vmem:[#allocation3 + $0x5f0] sm:$0xff] }
 0x1bf   :  { %v310_v34 = vmax.f32 %v308_v32, 0.0  ;;  %v1590_v32 = vpack.c.bf16 %v596_v31, %v594_v30  ;;  %v772_v30 = vld [vmem:[#allocation3 + $0x608] sm:$0xff]  ;;  %v774_v31 = vld [vmem:[#allocation3 + $0x618] sm:$0xff] }
 0x1c0   :  { %v311_v35 = vmax.f32 %v309_v33, 0.0  ;;  %v593_v33 = vld [vmem:[#allocation3 + $0x500] sm:$0xff] }
 0x1c1   :  { %v312_v36 = vadd.f32 1e-05, %v310_v34  ;;  %v595_v34 = vld [vmem:[#allocation3 + $0x510] sm:$0xff] }
 0x1c2   :  { %v313_v37 = vadd.f32 1e-05, %v311_v35  ;;  %v1592_v35 = vpack.c.bf16 %v595_v34, %v593_v33  ;;  %v1622_v33 = vpack.c.bf16 %v774_v31, %v772_v30  ;;  %v773_v34 = vld [vmem:[#allocation3 + $0x610] sm:$0xff] }
 0x1c3   :  { %1824 = vrsqrt.f32 %v312_v36  ;;  %v598_v36 = vld [vmem:[#allocation3 + $0x528] sm:$0xff] }
 0x1c4   :  { %1826 = vrsqrt.f32 %v313_v37  ;;  %v600_v37 = vld [vmem:[#allocation3 + $0x538] sm:$0xff]  ;;  %1623 = vmatprep.subr.bf16.mxu1 %v1622_v33 }
 0x1cd   :  { %v1825_v38 = vpop.eup %1824 }
 0x1ce   :  { %v1827_v39 = vpop.eup %1826  ;;  %v316_v40 = vmul.f32 %v1825_v38, %v1972_v43  ;;  %v1594_v38 = vpack.c.bf16 %v600_v37, %v598_v36  ;;  %v778_v36 = vld [vmem:[#allocation3 + $0x638] sm:$0xff] }
 0x1cf   :  { %v317_v44 = vmul.f32 %v1827_v39, %v1970_v42  ;;  %v597_v39 = vld [vmem:[#allocation3 + $0x520] sm:$0xff] }
 0x1d0   :  { %v318_v45 = vmul.f32 %v316_v40, %v288_v24  ;;  %v331_v48 = vrot.slane %v316_v40, %v2000_v41  ;;  %v590_v24 = vld [vmem:[#allocation3 + $0x4e8] sm:$0xff]  ;;  %v599_v40 = vld [vmem:[#allocation3 + $0x530] sm:$0xff] }
 0x1d1   :  { %v319_v46 = vmul.f32 %v317_v44, %v289_v26  ;;  %v335_v51 = vrot.slane %v317_v44, %v2000_v41  ;;  %v1586_v26 = vpack.c.bf16 %v592_v25, %v590_v24  ;;  %v1596_v44 = vpack.c.bf16 %v599_v40, %v597_v39  ;;  %v622_v24 = vld [vmem:[#allocation3 + $0x5e8] sm:$0xff]  ;;  %v624_v25 = vld [vmem:[#allocation3 + $0x5f8] sm:$0xff]  ;;  %v775_v39 = vld [vmem:[#allocation3 + $0x620] sm:$0xff] }
 0x1d2   :  { %v322_v49 = vrot.slane %v318_v45, 1  ;;  %v336_v56 = vmul.f32 %v331_v48, %v271_v54  ;;  %v578_v54 = vld [vmem:[#allocation3 + $0x488] sm:$0xff]  ;;  %v1618_v27 = vpack.c.bf16 %v624_v25, %v622_v24  ;;  %v777_v40 = vld [vmem:[#allocation3 + $0x630] sm:$0xff] }
 0x1d3   :  { %v323_v50 = vrot.slane %v319_v46, 1  ;;  %v337_v63 = vmul.f32 %v335_v51, %v273_v57  ;;  %v1574_v10 = vpack.c.bf16 %v580_v2, %v578_v54  ;;  %v577_v57 = vld [vmem:[#allocation3 + $0x480] sm:$0xff]  ;;  %v602_v45 = vld [vmem:[#allocation3 + $0x548] sm:$0xff]  ;;  %v604_v46 = vld [vmem:[#allocation3 + $0x558] sm:$0xff] }
 0x1d4   :  { %v326_v52 = vsub.f32 %v1962_v61, %v322_v49  ;;  %v1598_v48 = vpack.c.bf16 %v604_v46, %v602_v45  ;;  %v601_v49 = vld [vmem:[#allocation3 + $0x540] sm:$0xff]  ;;  %v610_v54 = vld [vmem:[#allocation3 + $0x588] sm:$0xff]  ;;  %v612_v2 = vld [vmem:[#allocation3 + $0x598] sm:$0xff]  ;;  %v1628_v46 = vpack.c.bf16 %v777_v40, %v775_v39 }
 0x1d5   :  { %v327_v55 = vsub.f32 %v1964_v62, %v323_v50  ;;  %1575 = vmatprep.subr.bf16.mxu0 %v1574_v10  ;;  %v603_v50 = vld [vmem:[#allocation3 + $0x550] sm:$0xff]  ;;  %v1606_v10 = vpack.c.bf16 %v612_v2, %v610_v54  ;;  %v782_v45 = vld [vmem:[#allocation3 + $0x658] sm:$0xff] }
 0x1d6   :  { %v341_v58 = vrot.slane %v326_v52, %v1976_v47  ;;  %v1600_v51 = vpack.c.bf16 %v603_v50, %v601_v49  ;;  %v606_v52 = vld [vmem:[#allocation3 + $0x568] sm:$0xff]  ;;  %v779_v49 = vld [vmem:[#allocation3 + $0x640] sm:$0xff]  ;;  %v781_v50 = vld [vmem:[#allocation3 + $0x650] sm:$0xff] }
 0x1d7   :  { %v345_v0 = vrot.slane %v327_v55, %v1976_v47  ;;  %v1576_v47 = vpack.c.bf16 %v579_v11, %v577_v57  ;;  %v608_v55 = vld [vmem:[#allocation3 + $0x578] sm:$0xff]  ;;  %v609_v57 = vld [vmem:[#allocation3 + $0x580] sm:$0xff]  ;;  %v611_v11 = vld [vmem:[#allocation3 + $0x590] sm:$0xff] }
 0x1d8   :  { %v2009_v1 = vadd.f32 %v341_v58, %v336_v56  ;;  %v1602_v56 = vpack.c.bf16 %v608_v55, %v606_v52  ;;  %v605_v58 = vld [vmem:[#allocation3 + $0x560] sm:$0xff]  ;;  %v786_v52 = vld [vmem:[#allocation3 + $0x678] sm:$0xff]  ;;  %v1632_v55 = vpack.c.bf16 %v781_v50, %v779_v49 }
 0x1d9   :  { %v2011_v3 = vadd.f32 %v345_v0, %v337_v63  ;;  %1577 = vmatpush1.bf16.msra.mxu0 %v1576_v47  ;;  %v607_v63 = vld [vmem:[#allocation3 + $0x570] sm:$0xff]  ;;  %v1608_v47 = vpack.c.bf16 %v611_v11, %v609_v57 }
 0x1da   :  { %v348_v9 = vmax.f32 %v2009_v1, 0.0  ;;  %1579 = vmatprep.subr.bf16.mxu0 %v1578_v14  ;;  %v1604_v0 = vpack.c.bf16 %v607_v63, %v605_v58  ;;  %v1610_v14 = vpack.c.bf16 %v616_v13, %v614_v12  ;;  %v783_v58 = vld [vmem:[#allocation3 + $0x660] sm:$0xff]  ;;  %v785_v63 = vld [vmem:[#allocation3 + $0x670] sm:$0xff] }
 0x1db   :  { %v349_v8 = vmax.f32 %v2011_v3, 0.0 }
 0x1dd   :  { %479 = vmatprep.mubr.f32.mxu1 %v349_v8  ;;  %1581 = vmatpush1.bf16.msra.mxu0 %v1580_v17  ;;  %v1612_v17 = vpack.c.bf16 %v615_v16, %v613_v15 }
 0x1de   :  { %480 = vmatmul.mubr.f32.vlgmr.msra.gmra.mrb[0].mxu1 %v348_v9  ;;  %1583 = vmatprep.subr.bf16.mxu0 %v1582_v20  ;;  %v1614_v20 = vpack.c.bf16 %v620_v19, %v618_v18 }
 0x1e1   :  { %1585 = vmatpush1.bf16.msra.mxu0 %v1584_v23  ;;  %v1616_v23 = vpack.c.bf16 %v619_v22, %v617_v21 }
 0x1e2   :  { %1587 = vmatprep.subr.bf16.mxu0 %v1586_v26  ;;  %v621_v26 = vld [vmem:[#allocation3 + $0x5e0] sm:$0xff] }
 0x1e5   :  { %1589 = vmatpush1.bf16.msra.mxu0 %v1588_v29  ;;  %v1620_v29 = vpack.c.bf16 %v623_v28, %v621_v26 }
 0x1e6   :  { %1591 = vmatprep.subr.bf16.mxu0 %v1590_v32  ;;  %v771_v32 = vld [vmem:[#allocation3 + $0x600] sm:$0xff] }
 0x1e7   :  { %v1624_v37 = vpack.c.bf16 %v773_v34, %v771_v32 }
 0x1e9   :  { %1593 = vmatpush1.bf16.msra.mxu0 %v1592_v35  ;;  %v776_v35 = vld [vmem:[#allocation3 + $0x628] sm:$0xff]  ;;  %1625 = vmatpush1.bf16.msra.mxu1 %v1624_v37 }
 0x1ea   :  { %1595 = vmatprep.subr.bf16.mxu0 %v1594_v38  ;;  %v1626_v38 = vpack.c.bf16 %v778_v36, %v776_v35 }
 0x1ec   :  { %1627 = vmatprep.subr.bf16.mxu1 %v1626_v38 }
 0x1ed   :  { %1597 = vmatpush1.bf16.msra.mxu0 %v1596_v44  ;;  %v780_v44 = vld [vmem:[#allocation3 + $0x648] sm:$0xff]  ;;  %1629 = vmatpush1.bf16.msra.mxu1 %v1628_v46 }
 0x1ee   :  { %1599 = vmatprep.subr.bf16.mxu0 %v1598_v48  ;;  %v1630_v48 = vpack.c.bf16 %v782_v45, %v780_v44 }
 0x1f0   :  { %1631 = vmatprep.subr.bf16.mxu1 %v1630_v48 }
 0x1f1   :  { %1601 = vmatpush1.bf16.msra.mxu0 %v1600_v51  ;;  %v784_v51 = vld [vmem:[#allocation3 + $0x668] sm:$0xff]  ;;  %1633 = vmatpush1.bf16.msra.mxu1 %v1632_v55  ;;  %v2021_v55 = vsub.s32 2, %v1957_v59 }
 0x1f2   :  { %1603 = vmatprep.subr.bf16.mxu0 %v1602_v56  ;;  %v1634_v56 = vpack.c.bf16 %v786_v52, %v784_v51 }
 0x1f4   :  { %1635 = vmatprep.subr.bf16.mxu1 %v1634_v56 }
 0x1f5   :  { %1605 = vmatpush1.bf16.msra.mxu0 %v1604_v0  ;;  %v1636_v0 = vpack.c.bf16 %v785_v63, %v783_v58 }
 0x1f6   :  { %1607 = vmatprep.subr.bf16.mxu0 %v1606_v10 }
 0x1f7   :  { %1637 = vmatpush1.bf16.msra.mxu1 %v1636_v0 }
 0x1f9   :  { %1609 = vmatpush1.bf16.msra.mxu0 %v1608_v47 }
 0x1fa   :  { %1611 = vmatprep.subr.bf16.mxu0 %v1610_v14 }
 0x1fd   :  { %1613 = vmatpush1.bf16.msra.mxu0 %v1612_v17 }
 0x1fe   :  { %1615 = vmatprep.subr.bf16.mxu0 %v1614_v20 }
 0x201   :  { %1617 = vmatpush1.bf16.msra.mxu0 %v1616_v23 }
 0x202   :  { %1619 = vmatprep.subr.bf16.mxu0 %v1618_v27 }
 0x205   :  { %1621 = vmatpush1.bf16.msra.mxu0 %v1620_v29 }
 0x2b1   :  { %v481_v54 = vpop.f32.mrb[0].mxu1 }
 0x2b2   :  { %v486_v2 = vrot.slane %v481_v54, 4  ;;  %v500_v10 = vmul.f32 %v481_v54, %v481_v54  ;;  %v483_v57 = vpop.f32.mrb[1].mxu1 }
 0x2b3   :  { %v492_v11 = vrot.slane %v483_v57, 4  ;;  %v501_v47 = vmul.f32 %v483_v57, %v483_v57 }
 0x2b4   :  { %v487_v12 = vadd.f32 %v486_v2, %v481_v54  ;;  %v502_v13 = vrot.slane %v500_v10, 4 }
 0x2b5   :  { %v493_v14 = vadd.f32 %v492_v11, %v483_v57  ;;  %v508_v15 = vrot.slane %v501_v47, 4 }
 0x2b6   :  { %v488_v16 = vrot.slane %v487_v12, 2  ;;  %v503_v17 = vadd.f32 %v502_v13, %v500_v10 }
 0x2b7   :  { %v494_v18 = vrot.slane %v493_v14, 2  ;;  %v509_v19 = vadd.f32 %v508_v15, %v501_v47 }
 0x2b8   :  { %v489_v20 = vadd.f32 %v488_v16, %v487_v12  ;;  %v504_v21 = vrot.slane %v503_v17, 2 }
 0x2b9   :  { %v495_v22 = vadd.f32 %v494_v18, %v493_v14  ;;  %v510_v23 = vrot.slane %v509_v19, 2 }
 0x2ba   :  { %v490_v24 = vrot.slane %v489_v20, 1  ;;  %v505_v25 = vadd.f32 %v504_v21, %v503_v17  ;;  %v794_v21 = vld [vmem:[#allocation3 + $0x6b8] sm:$0xff] }
 0x2bb   :  { %v496_v26 = vrot.slane %v495_v22, 1  ;;  %v511_v27 = vadd.f32 %v510_v23, %v509_v19  ;;  %v789_v19 = vld [vmem:[#allocation3 + $0x690] sm:$0xff]  ;;  %v791_v23 = vld [vmem:[#allocation3 + $0x6a0] sm:$0xff] }
 0x2bc   :  { %v491_v28 = vadd.f32 %v490_v24, %v489_v20  ;;  %v506_v29 = vrot.slane %v505_v25, 1  ;;  %v792_v20 = vld [vmem:[#allocation3 + $0x6a8] sm:$0xff]  ;;  %v793_v24 = vld [vmem:[#allocation3 + $0x6b0] sm:$0xff] }
 0x2bd   :  { %v497_v30 = vadd.f32 %v496_v26, %v495_v22  ;;  %v512_v31 = vrot.slane %v511_v27, 1  ;;  %v1642_v22 = vpack.c.bf16 %v794_v21, %v792_v20  ;;  %v796_v26 = vld [vmem:[#allocation3 + $0x6c8] sm:$0xff]  ;;  %v826_v21 = vld [vmem:[#allocation3 + $0x7b8] sm:$0xff] }
 0x2be   :  { %v498_v32 = vmul.f32 0.125, %v491_v28  ;;  %v507_v33 = vadd.f32 %v506_v29, %v505_v25  ;;  %v1644_v25 = vpack.c.bf16 %v793_v24, %v791_v23  ;;  %v795_v29 = vld [vmem:[#allocation3 + $0x6c0] sm:$0xff]  ;;  %v824_v20 = vld [vmem:[#allocation3 + $0x7a8] sm:$0xff]  ;;  %v825_v24 = vld [vmem:[#allocation3 + $0x7b0] sm:$0xff] }
 0x2bf   :  { %v499_v34 = vmul.f32 0.125, %v497_v30  ;;  %v513_v35 = vadd.f32 %v512_v31, %v511_v27  ;;  %v798_v27 = vld [vmem:[#allocation3 + $0x6d8] sm:$0xff]  ;;  %v797_v30 = vld [vmem:[#allocation3 + $0x6d0] sm:$0xff]  ;;  %v823_v23 = vld [vmem:[#allocation3 + $0x7a0] sm:$0xff] }
 0x2c0   :  { %v514_v36 = vmul.f32 0.125, %v507_v33  ;;  %v516_v37 = vmul.f32 %v498_v32, %v498_v32  ;;  %v1646_v28 = vpack.c.bf16 %v798_v27, %v796_v26  ;;  %v1648_v31 = vpack.c.bf16 %v797_v30, %v795_v29  ;;  %v802_v33 = vld [vmem:[#allocation3 + $0x6f8] sm:$0xff]  ;;  %v828_v26 = vld [vmem:[#allocation3 + $0x7c8] sm:$0xff]  ;;  %v827_v29 = vld [vmem:[#allocation3 + $0x7c0] sm:$0xff] }
 0x2c1   :  { %v515_v38 = vmul.f32 0.125, %v513_v35  ;;  %v517_v39 = vmul.f32 %v499_v34, %v499_v34  ;;  %v799_v35 = vld [vmem:[#allocation3 + $0x6e0] sm:$0xff]  ;;  %v830_v27 = vld [vmem:[#allocation3 + $0x7d8] sm:$0xff]  ;;  %v829_v30 = vld [vmem:[#allocation3 + $0x7d0] sm:$0xff] }
 0x2c2   :  { %v518_v40 = vsub.f32 %v514_v36, %v516_v37  ;;  %v801_v36 = vld [vmem:[#allocation3 + $0x6f0] sm:$0xff] }
 0x2c3   :  { %v519_v44 = vsub.f32 %v515_v38, %v517_v39  ;;  %v1652_v37 = vpack.c.bf16 %v801_v36, %v799_v35  ;;  %v804_v38 = vld [vmem:[#allocation3 + $0x708] sm:$0xff]  ;;  %v806_v39 = vld [vmem:[#allocation3 + $0x718] sm:$0xff]  ;;  %v833_v36 = vld [vmem:[#allocation3 + $0x7f0] sm:$0xff] }
 0x2c4   :  { %v520_v45 = vmax.f32 %v518_v40, 0.0  ;;  %v1654_v40 = vpack.c.bf16 %v806_v39, %v804_v38  ;;  %v984_v38 = vld [vmem:[#allocation3 + $0x808] sm:$0xff]  ;;  %v986_v39 = vld [vmem:[#allocation3 + $0x818] sm:$0xff] }
 0x2c5   :  { %v521_v46 = vmax.f32 %v519_v44, 0.0  ;;  %v803_v44 = vld [vmem:[#allocation3 + $0x700] sm:$0xff] }
 0x2c6   :  { %v522_v48 = vadd.f32 1e-05, %v520_v45  ;;  %v805_v45 = vld [vmem:[#allocation3 + $0x710] sm:$0xff] }
 0x2c7   :  { %v523_v49 = vadd.f32 1e-05, %v521_v46  ;;  %v1656_v46 = vpack.c.bf16 %v805_v45, %v803_v44  ;;  %v1686_v44 = vpack.c.bf16 %v986_v39, %v984_v38  ;;  %v985_v45 = vld [vmem:[#allocation3 + $0x810] sm:$0xff] }
 0x2c8   :  { %1828 = vrsqrt.f32 %v522_v48  ;;  %v808_v48 = vld [vmem:[#allocation3 + $0x728] sm:$0xff] }
 0x2c9   :  { %1830 = vrsqrt.f32 %v523_v49  ;;  %v810_v49 = vld [vmem:[#allocation3 + $0x738] sm:$0xff]  ;;  %1687 = vmatprep.subr.bf16.mxu0 %v1686_v44 }
 0x2d2   :  { %v1829_v50 = vpop.eup %1828 }
 0x2d3   :  { %v1831_v51 = vpop.eup %1830  ;;  %v526_v52 = vmul.f32 %v1829_v50, %v1972_v43  ;;  %v1658_v50 = vpack.c.bf16 %v810_v49, %v808_v48  ;;  %v990_v48 = vld [vmem:[#allocation3 + $0x838] sm:$0xff] }
 0x2d4   :  { %v527_v56 = vmul.f32 %v1831_v51, %v1970_v42  ;;  %v807_v51 = vld [vmem:[#allocation3 + $0x720] sm:$0xff] }
 0x2d5   :  { %v528_v58 = vmul.f32 %v526_v52, %v498_v32  ;;  %v541_v2 = vrot.slane %v526_v52, %v2021_v55  ;;  %v800_v32 = vld [vmem:[#allocation3 + $0x6e8] sm:$0xff]  ;;  %v809_v52 = vld [vmem:[#allocation3 + $0x730] sm:$0xff] }
 0x2d6   :  { %v529_v63 = vmul.f32 %v527_v56, %v499_v34  ;;  %v545_v10 = vrot.slane %v527_v56, %v2021_v55  ;;  %v1650_v34 = vpack.c.bf16 %v802_v33, %v800_v32  ;;  %v1660_v56 = vpack.c.bf16 %v809_v52, %v807_v51  ;;  %v832_v32 = vld [vmem:[#allocation3 + $0x7e8] sm:$0xff]  ;;  %v834_v33 = vld [vmem:[#allocation3 + $0x7f8] sm:$0xff]  ;;  %v987_v51 = vld [vmem:[#allocation3 + $0x820] sm:$0xff] }
 0x2d7   :  { %v532_v0 = vrot.slane %v528_v58, 1  ;;  %v546_v13 = vmul.f32 %v541_v2, %v481_v54  ;;  %v812_v58 = vld [vmem:[#allocation3 + $0x748] sm:$0xff]  ;;  %v811_v2 = vld [vmem:[#allocation3 + $0x740] sm:$0xff]  ;;  %v1682_v35 = vpack.c.bf16 %v834_v33, %v832_v32  ;;  %v989_v52 = vld [vmem:[#allocation3 + $0x830] sm:$0xff] }
 0x2d8   :  { %v533_v11 = vrot.slane %v529_v63, 1  ;;  %v547_v14 = vmul.f32 %v545_v10, %v483_v57  ;;  %v787_v57 = vld [vmem:[#allocation3 + $0x680] sm:$0xff]  ;;  %v814_v63 = vld [vmem:[#allocation3 + $0x758] sm:$0xff]  ;;  %v813_v10 = vld [vmem:[#allocation3 + $0x750] sm:$0xff] }
 0x2d9   :  { %v536_v47 = vsub.f32 %v1962_v61, %v532_v0  ;;  %v788_v61 = vld [vmem:[#allocation3 + $0x688] sm:$0xff]  ;;  %v1662_v0 = vpack.c.bf16 %v814_v63, %v812_v58  ;;  %v994_v58 = vld [vmem:[#allocation3 + $0x858] sm:$0xff]  ;;  %v1692_v63 = vpack.c.bf16 %v989_v52, %v987_v51 }
 0x2da   :  { %v537_v12 = vsub.f32 %v1964_v62, %v533_v11  ;;  %v790_v62 = vld [vmem:[#allocation3 + $0x698] sm:$0xff]  ;;  %v1664_v11 = vpack.c.bf16 %v813_v10, %v811_v2  ;;  %v991_v2 = vld [vmem:[#allocation3 + $0x840] sm:$0xff]  ;;  %v993_v10 = vld [vmem:[#allocation3 + $0x850] sm:$0xff] }
 0x2db   :  { %v551_v43 = vrot.slane %v536_v47, %v2000_v41  ;;  %v1638_v54 = vpack.c.bf16 %v790_v62, %v788_v61  ;;  %v816_v47 = vld [vmem:[#allocation3 + $0x768] sm:$0xff]  ;;  %v822_v62 = vld [vmem:[#allocation3 + $0x798] sm:$0xff] }
 0x2dc   :  { %v555_v15 = vrot.slane %v537_v12, %v2000_v41  ;;  %v1640_v41 = vpack.c.bf16 %v789_v19, %v787_v57  ;;  %v818_v12 = vld [vmem:[#allocation3 + $0x778] sm:$0xff]  ;;  %v820_v61 = vld [vmem:[#allocation3 + $0x788] sm:$0xff]  ;;  %v819_v57 = vld [vmem:[#allocation3 + $0x780] sm:$0xff] }
 0x2dd   :  { %v2030_v16 = vadd.f32 %v551_v43, %v546_v13  ;;  %1639 = vmatprep.subr.bf16.mxu1 %v1638_v54  ;;  %v1666_v13 = vpack.c.bf16 %v818_v12, %v816_v47  ;;  %v815_v43 = vld [vmem:[#allocation3 + $0x760] sm:$0xff]  ;;  %v1670_v54 = vpack.c.bf16 %v822_v62, %v820_v61  ;;  %v821_v19 = vld [vmem:[#allocation3 + $0x790] sm:$0xff] }
 0x2de   :  { %v2032_v42 = vadd.f32 %v555_v15, %v547_v14  ;;  %1641 = vmatpush1.bf16.msra.mxu1 %v1640_v41  ;;  %v817_v14 = vld [vmem:[#allocation3 + $0x770] sm:$0xff]  ;;  %v1672_v41 = vpack.c.bf16 %v821_v19, %v819_v57 }
 0x2df   :  { %v558_v18 = vmax.f32 %v2030_v16, 0.0  ;;  %1643 = vmatprep.subr.bf16.mxu1 %v1642_v22  ;;  %v1668_v15 = vpack.c.bf16 %v817_v14, %v815_v43  ;;  %v1674_v22 = vpack.c.bf16 %v826_v21, %v824_v20  ;;  %v1216_v16 = vld [vmem:[#allocation3 + $0xaa8] sm:$0xff] }
 0x2e0   :  { %v559_v17 = vmax.f32 %v2032_v42, 0.0 }
 0x2e2   :  { %689 = vmatprep.mubr.f32.mxu0 %v559_v17  ;;  %1645 = vmatpush1.bf16.msra.mxu1 %v1644_v25  ;;  %v1676_v25 = vpack.c.bf16 %v825_v24, %v823_v23 }
 0x2e3   :  { %690 = vmatmul.mubr.f32.vlgmr.msra.gmra.mrb[2].mxu0 %v558_v18  ;;  %1647 = vmatprep.subr.bf16.mxu1 %v1646_v28  ;;  %v1678_v28 = vpack.c.bf16 %v830_v27, %v828_v26 }
 0x2e6   :  { %1649 = vmatpush1.bf16.msra.mxu1 %v1648_v31  ;;  %v1680_v31 = vpack.c.bf16 %v829_v30, %v827_v29 }
 0x2e7   :  { %1651 = vmatprep.subr.bf16.mxu1 %v1650_v34  ;;  %v831_v34 = vld [vmem:[#allocation3 + $0x7e0] sm:$0xff] }
 0x2ea   :  { %1653 = vmatpush1.bf16.msra.mxu1 %v1652_v37  ;;  %v1684_v37 = vpack.c.bf16 %v833_v36, %v831_v34 }
 0x2eb   :  { %1655 = vmatprep.subr.bf16.mxu1 %v1654_v40  ;;  %v983_v40 = vld [vmem:[#allocation3 + $0x800] sm:$0xff] }
 0x2ec   :  { %v1688_v49 = vpack.c.bf16 %v985_v45, %v983_v40 }
 0x2ee   :  { %1657 = vmatpush1.bf16.msra.mxu1 %v1656_v46  ;;  %v988_v46 = vld [vmem:[#allocation3 + $0x828] sm:$0xff]  ;;  %1689 = vmatpush1.bf16.msra.mxu0 %v1688_v49 }
 0x2ef   :  { %1659 = vmatprep.subr.bf16.mxu1 %v1658_v50  ;;  %v1690_v50 = vpack.c.bf16 %v990_v48, %v988_v46 }
 0x2f1   :  { %1691 = vmatprep.subr.bf16.mxu0 %v1690_v50 }
 0x2f2   :  { %1661 = vmatpush1.bf16.msra.mxu1 %v1660_v56  ;;  %v992_v56 = vld [vmem:[#allocation3 + $0x848] sm:$0xff]  ;;  %1693 = vmatpush1.bf16.msra.mxu0 %v1692_v63 }
 0x2f3   :  { %1663 = vmatprep.subr.bf16.mxu1 %v1662_v0  ;;  %v1694_v0 = vpack.c.bf16 %v994_v58, %v992_v56  ;;  %v2040_v58 = vld [vmem:[#allocation5] sm:$0xff] }
 0x2f5   :  { %1695 = vmatprep.subr.bf16.mxu0 %v1694_v0  ;;  %v2044_v0 = vsub.s32 3, %v1957_v59 }
 0x2f6   :  { %1665 = vmatpush1.bf16.msra.mxu1 %v1664_v11  ;;  %v1696_v11 = vpack.c.bf16 %v993_v10, %v991_v2  ;;  %v2046_v2 = vld [vmem:[#allocation5 + $0x8] sm:$0xff] }
 0x2f7   :  { %1667 = vmatprep.subr.bf16.mxu1 %v1666_v13 }
 0x2f8   :  { %1697 = vmatpush1.bf16.msra.mxu0 %v1696_v11 }
 0x2fa   :  { %1669 = vmatpush1.bf16.msra.mxu1 %v1668_v15 }
 0x2fb   :  { %1671 = vmatprep.subr.bf16.mxu1 %v1670_v54 }
 0x2fe   :  { %1673 = vmatpush1.bf16.msra.mxu1 %v1672_v41 }
 0x2ff   :  { %1675 = vmatprep.subr.bf16.mxu1 %v1674_v22 }
 0x302   :  { %1677 = vmatpush1.bf16.msra.mxu1 %v1676_v25 }
 0x303   :  { %1679 = vmatprep.subr.bf16.mxu1 %v1678_v28 }
 0x306   :  { %1681 = vmatpush1.bf16.msra.mxu1 %v1680_v31 }
 0x307   :  { %1683 = vmatprep.subr.bf16.mxu1 %v1682_v35 }
 0x30a   :  { %1685 = vmatpush1.bf16.msra.mxu1 %v1684_v37 }
 0x3b6   :  { %v691_v47 = vpop.f32.mrb[2].mxu0 }
 0x3b7   :  { %v696_v12 = vrot.slane %v691_v47, 4  ;;  %v710_v13 = vmul.f32 %v691_v47, %v691_v47  ;;  %v693_v43 = vpop.f32.mrb[3].mxu0 }
 0x3b8   :  { %v702_v14 = vrot.slane %v693_v43, 4  ;;  %v711_v15 = vmul.f32 %v693_v43, %v693_v43 }
 0x3b9   :  { %v697_v61 = vadd.f32 %v696_v12, %v691_v47  ;;  %v712_v62 = vrot.slane %v710_v13, 4 }
 0x3ba   :  { %v703_v54 = vadd.f32 %v702_v14, %v693_v43  ;;  %v718_v57 = vrot.slane %v711_v15, 4 }
 0x3bb   :  { %v698_v19 = vrot.slane %v697_v61, 2  ;;  %v713_v41 = vadd.f32 %v712_v62, %v710_v13  ;;  %v2051_v62 = vld [vmem:[#allocation5 + $0x10] sm:$0xff] }
 0x3bc   :  { %v704_v20 = vrot.slane %v703_v54, 2  ;;  %v719_v21 = vadd.f32 %v718_v57, %v711_v15  ;;  %v2054_v57 = vld [vmem:[#allocation5 + $0x18] sm:$0xff] }
 0x3bd   :  { %v699_v22 = vadd.f32 %v698_v19, %v697_v61  ;;  %v714_v23 = vrot.slane %v713_v41, 2 }
 0x3be   :  { %v705_v24 = vadd.f32 %v704_v20, %v703_v54  ;;  %v720_v25 = vrot.slane %v719_v21, 2 }
 0x3bf   :  { %v700_v26 = vrot.slane %v699_v22, 1  ;;  %v715_v27 = vadd.f32 %v714_v23, %v713_v41 }
 0x3c0   :  { %v706_v28 = vrot.slane %v705_v24, 1  ;;  %v721_v29 = vadd.f32 %v720_v25, %v719_v21 }
 0x3c1   :  { %v701_v30 = vadd.f32 %v700_v26, %v699_v22  ;;  %v716_v31 = vrot.slane %v715_v27, 1 }
 0x3c2   :  { %v707_v32 = vadd.f32 %v706_v28, %v705_v24  ;;  %v722_v33 = vrot.slane %v721_v29, 1  ;;  %v998_v28 = vld [vmem:[#allocation3 + $0x878] sm:$0xff] }
 0x3c3   :  { %v708_v34 = vmul.f32 0.125, %v701_v30  ;;  %v717_v35 = vadd.f32 %v716_v31, %v715_v27  ;;  %v996_v27 = vld [vmem:[#allocation3 + $0x868] sm:$0xff]  ;;  %v995_v30 = vld [vmem:[#allocation3 + $0x860] sm:$0xff]  ;;  %v997_v31 = vld [vmem:[#allocation3 + $0x870] sm:$0xff] }
 0x3c4   :  { %v709_v36 = vmul.f32 0.125, %v707_v32  ;;  %v723_v37 = vadd.f32 %v722_v33, %v721_v29  ;;  %v1698_v29 = vpack.c.bf16 %v998_v28, %v996_v27  ;;  %v1700_v32 = vpack.c.bf16 %v997_v31, %v995_v30  ;;  %v1002_v33 = vld [vmem:[#allocation3 + $0x898] sm:$0xff]  ;;  %v1023_v28 = vld [vmem:[#allocation3 + $0x940] sm:$0xff]  ;;  %v1028_v31 = vld [vmem:[#allocation3 + $0x968] sm:$0xff] }
 0x3c5   :  { %v724_v38 = vmul.f32 0.125, %v717_v35  ;;  %v726_v39 = vmul.f32 %v708_v34, %v708_v34  ;;  %v1001_v35 = vld [vmem:[#allocation3 + $0x890] sm:$0xff] }
 0x3c6   :  { %v725_v40 = vmul.f32 0.125, %v723_v37  ;;  %v727_v44 = vmul.f32 %v709_v36, %v709_v36  ;;  %1699 = vmatprep.subr.bf16.mxu0 %v1698_v29  ;;  %v1006_v37 = vld [vmem:[#allocation3 + $0x8b8] sm:$0xff]  ;;  %v1025_v29 = vld [vmem:[#allocation3 + $0x950] sm:$0xff] }
 0x3c7   :  { %v728_v45 = vsub.f32 %v724_v38, %v726_v39  ;;  %1701 = vmatpush1.bf16.msra.mxu0 %v1700_v32  ;;  %v1003_v39 = vld [vmem:[#allocation3 + $0x8a0] sm:$0xff]  ;;  %v1728_v30 = vpack.c.bf16 %v1025_v29, %v1023_v28  ;;  %v1030_v32 = vld [vmem:[#allocation3 + $0x978] sm:$0xff]  ;;  %v1204_v28 = vld [vmem:[#allocation3 + $0xa48] sm:$0xff] }
 0x3c8   :  { %v729_v46 = vsub.f32 %v725_v40, %v727_v44  ;;  %v1005_v40 = vld [vmem:[#allocation3 + $0x8b0] sm:$0xff]  ;;  %v1206_v29 = vld [vmem:[#allocation3 + $0xa58] sm:$0xff] }
 0x3c9   :  { %v730_v48 = vmax.f32 %v728_v45, 0.0  ;;  %v1708_v44 = vpack.c.bf16 %v1005_v40, %v1003_v39  ;;  %v1008_v45 = vld [vmem:[#allocation3 + $0x8c8] sm:$0xff] }
 0x3ca   :  { %v731_v49 = vmax.f32 %v729_v46, 0.0  ;;  %v1010_v46 = vld [vmem:[#allocation3 + $0x8d8] sm:$0xff]  ;;  %v1036_v40 = vld [vmem:[#allocation3 + $0x9a8] sm:$0xff] }
 0x3cb   :  { %v732_v50 = vadd.f32 1e-05, %v730_v48  ;;  %v1710_v48 = vpack.c.bf16 %v1010_v46, %v1008_v45  ;;  %v1035_v46 = vld [vmem:[#allocation3 + $0x9a0] sm:$0xff] }
 0x3cc   :  { %v733_v51 = vadd.f32 1e-05, %v731_v49  ;;  %v1007_v49 = vld [vmem:[#allocation3 + $0x8c0] sm:$0xff] }
 0x3cd   :  { %1832 = vrsqrt.f32 %v732_v50  ;;  %v1009_v50 = vld [vmem:[#allocation3 + $0x8d0] sm:$0xff] }
 0x3ce   :  { %1834 = vrsqrt.f32 %v733_v51  ;;  %v1712_v51 = vpack.c.bf16 %v1009_v50, %v1007_v49  ;;  %v1040_v50 = vld [vmem:[#allocation3 + $0x9c8] sm:$0xff] }
 0x3d7   :  { %v1833_v52 = vpop.eup %1832 }
 0x3d8   :  { %v1835_v56 = vpop.eup %1834  ;;  %v736_v63 = vmul.f32 %v2040_v58, %v1833_v52  ;;  %v1012_v52 = vld [vmem:[#allocation3 + $0x8e8] sm:$0xff] }
 0x3d9   :  { %v737_v10 = vmul.f32 %v2046_v2, %v1835_v56  ;;  %v1014_v56 = vld [vmem:[#allocation3 + $0x8f8] sm:$0xff] }
 0x3da   :  { %v738_v11 = vmul.f32 %v736_v63, %v708_v34  ;;  %v751_v14 = vrot.slane %v736_v63, %v2044_v0  ;;  %v1714_v63 = vpack.c.bf16 %v1014_v56, %v1012_v52  ;;  %v1039_v56 = vld [vmem:[#allocation3 + $0x9c0] sm:$0xff] }
 0x3db   :  { %v739_v12 = vmul.f32 %v737_v10, %v709_v36  ;;  %v755_v15 = vrot.slane %v737_v10, %v2044_v0  ;;  %v1004_v36 = vld [vmem:[#allocation3 + $0x8a8] sm:$0xff]  ;;  %v1011_v10 = vld [vmem:[#allocation3 + $0x8e0] sm:$0xff] }
 0x3dc   :  { %v742_v13 = vrot.slane %v738_v11, 1  ;;  %v756_v41 = vmul.f32 %v751_v14, %v691_v47  ;;  %v1000_v47 = vld [vmem:[#allocation3 + $0x888] sm:$0xff]  ;;  %v1706_v38 = vpack.c.bf16 %v1006_v37, %v1004_v36  ;;  %v1013_v11 = vld [vmem:[#allocation3 + $0x8f0] sm:$0xff]  ;;  %v1018_v14 = vld [vmem:[#allocation3 + $0x918] sm:$0xff] }
 0x3dd   :  { %v743_v61 = vrot.slane %v739_v12, 1  ;;  %v757_v21 = vmul.f32 %v755_v15, %v693_v43  ;;  %v1702_v34 = vpack.c.bf16 %v1002_v33, %v1000_v47  ;;  %v999_v43 = vld [vmem:[#allocation3 + $0x880] sm:$0xff]  ;;  %v1716_v12 = vpack.c.bf16 %v1013_v11, %v1011_v10  ;;  %v1044_v11 = vld [vmem:[#allocation3 + $0x9e8] sm:$0xff] }
 0x3de   :  { %v746_v54 = vsub.f32 %v2051_v62, %v742_v13  ;;  %v1016_v13 = vld [vmem:[#allocation3 + $0x908] sm:$0xff]  ;;  %v1730_v47 = vpack.c.bf16 %v1030_v32, %v1028_v31  ;;  %v1027_v33 = vld [vmem:[#allocation3 + $0x960] sm:$0xff]  ;;  %v1758_v31 = vpack.c.bf16 %v1206_v29, %v1204_v28 }
 0x3df   :  { %v747_v19 = vsub.f32 %v2054_v57, %v743_v61  ;;  %1703 = vmatprep.subr.bf16.mxu0 %v1702_v34  ;;  %v1718_v15 = vpack.c.bf16 %v1018_v14, %v1016_v13  ;;  %v1015_v61 = vld [vmem:[#allocation3 + $0x900] sm:$0xff]  ;;  %v1029_v34 = vld [vmem:[#allocation3 + $0x970] sm:$0xff] }
 0x3e0   :  { %v761_v20 = vrot.slane %v746_v54, %v2021_v55  ;;  %v1017_v54 = vld [vmem:[#allocation3 + $0x910] sm:$0xff]  ;;  %v1031_v37 = vld [vmem:[#allocation3 + $0x980] sm:$0xff] }
 0x3e1   :  { %v765_v22 = vrot.slane %v747_v19, %v2021_v55  ;;  %v1704_v55 = vpack.c.bf16 %v1001_v35, %v999_v43  ;;  %v1720_v19 = vpack.c.bf16 %v1017_v54, %v1015_v61  ;;  %v1732_v43 = vpack.c.bf16 %v1029_v34, %v1027_v33  ;;  %v1032_v35 = vld [vmem:[#allocation3 + $0x988] sm:$0xff]  ;;  %v1043_v13 = vld [vmem:[#allocation3 + $0x9e0] sm:$0xff] }
 0x3e2   :  { %v766_v23 = vadd.f32 %v761_v20, %v756_v41  ;;  %v1020_v41 = vld [vmem:[#allocation3 + $0x928] sm:$0xff]  ;;  %v1022_v20 = vld [vmem:[#allocation3 + $0x938] sm:$0xff]  ;;  %v1203_v32 = vld [vmem:[#allocation3 + $0xa40] sm:$0xff] }
 0x3e3   :  { %v767_v24 = vadd.f32 %v765_v22, %v757_v21  ;;  %1705 = vmatpush1.bf16.msra.mxu0 %v1704_v55  ;;  %v1722_v21 = vpack.c.bf16 %v1022_v20, %v1020_v41  ;;  %v1019_v22 = vld [vmem:[#allocation3 + $0x920] sm:$0xff]  ;;  %v1034_v55 = vld [vmem:[#allocation3 + $0x998] sm:$0xff]  ;;  %v1196_v54 = vld [vmem:[#allocation3 + $0xa08] sm:$0xff] }
 0x3e4   :  { %v768_v26 = vmax.f32 %v766_v23, 0.0  ;;  %1707 = vmatprep.subr.bf16.mxu0 %v1706_v38  ;;  %v1021_v23 = vld [vmem:[#allocation3 + $0x930] sm:$0xff]  ;;  %v1734_v36 = vpack.c.bf16 %v1034_v55, %v1032_v35  ;;  %v1195_v41 = vld [vmem:[#allocation3 + $0xa00] sm:$0xff] }
 0x3e5   :  { %v769_v25 = vmax.f32 %v767_v24, 0.0  ;;  %v1724_v24 = vpack.c.bf16 %v1021_v23, %v1019_v22  ;;  %v1033_v38 = vld [vmem:[#allocation3 + $0x990] sm:$0xff]  ;;  %v1200_v22 = vld [vmem:[#allocation3 + $0xa28] sm:$0xff]  ;;  %v1202_v23 = vld [vmem:[#allocation3 + $0xa38] sm:$0xff] }
 0x3e6   :  { %v1736_v39 = vpack.c.bf16 %v1033_v38, %v1031_v37 }
 0x3e7   :  { %899 = vmatprep.mubr.f32.mxu1 %v769_v25  ;;  %1709 = vmatpush1.bf16.msra.mxu0 %v1708_v44  ;;  %v1024_v25 = vld [vmem:[#allocation3 + $0x948] sm:$0xff]  ;;  %v1038_v44 = vld [vmem:[#allocation3 + $0x9b8] sm:$0xff] }
 0x3e8   :  { %900 = vmatmul.mubr.f32.vlgmr.msra.gmra.mrb[2].mxu1 %v768_v26  ;;  %1711 = vmatprep.subr.bf16.mxu0 %v1710_v48  ;;  %v1026_v26 = vld [vmem:[#allocation3 + $0x958] sm:$0xff]  ;;  %v1738_v45 = vpack.c.bf16 %v1038_v44, %v1036_v40  ;;  %v1037_v48 = vld [vmem:[#allocation3 + $0x9b0] sm:$0xff] }
 0x3e9   :  { %v1726_v27 = vpack.c.bf16 %v1026_v26, %v1024_v25  ;;  %v1740_v49 = vpack.c.bf16 %v1037_v48, %v1035_v46  ;;  %v1754_v25 = vpack.c.bf16 %v1202_v23, %v1200_v22  ;;  %v1199_v26 = vld [vmem:[#allocation3 + $0xa20] sm:$0xff] }
 0x3eb   :  { %1713 = vmatpush1.bf16.msra.mxu0 %v1712_v51  ;;  %v1042_v51 = vld [vmem:[#allocation3 + $0x9d8] sm:$0xff] }
 0x3ec   :  { %1715 = vmatprep.subr.bf16.mxu0 %v1714_v63  ;;  %v1742_v52 = vpack.c.bf16 %v1042_v51, %v1040_v50  ;;  %v1041_v63 = vld [vmem:[#allocation3 + $0x9d0] sm:$0xff] }
 0x3ed   :  { %v1744_v10 = vpack.c.bf16 %v1041_v63, %v1039_v56 }
 0x3ef   :  { %1717 = vmatpush1.bf16.msra.mxu0 %v1716_v12  ;;  %v1046_v12 = vld [vmem:[#allocation3 + $0x9f8] sm:$0xff] }
 0x3f0   :  { %1719 = vmatprep.subr.bf16.mxu0 %v1718_v15  ;;  %v1746_v14 = vpack.c.bf16 %v1046_v12, %v1044_v11  ;;  %v1045_v15 = vld [vmem:[#allocation3 + $0x9f0] sm:$0xff] }
 0x3f1   :  { %v1748_v61 = vpack.c.bf16 %v1045_v15, %v1043_v13 }
 0x3f3   :  { %1721 = vmatpush1.bf16.msra.mxu0 %v1720_v19  ;;  %v1198_v19 = vld [vmem:[#allocation3 + $0xa18] sm:$0xff] }
 0x3f4   :  { %1723 = vmatprep.subr.bf16.mxu0 %v1722_v21  ;;  %v1750_v20 = vpack.c.bf16 %v1198_v19, %v1196_v54  ;;  %v1197_v21 = vld [vmem:[#allocation3 + $0xa10] sm:$0xff] }
 0x3f6   :  { %1751 = vmatprep.subr.bf16.mxu1 %v1750_v20 }
 0x3f7   :  { %1725 = vmatpush1.bf16.msra.mxu0 %v1724_v24  ;;  %v1752_v24 = vpack.c.bf16 %v1197_v21, %v1195_v41 }
 0x3f8   :  { %1727 = vmatprep.subr.bf16.mxu0 %v1726_v27  ;;  %v1201_v27 = vld [vmem:[#allocation3 + $0xa30] sm:$0xff] }
 0x3f9   :  { %1753 = vmatpush1.bf16.msra.mxu1 %v1752_v24 }
 0x3fa   :  { %1755 = vmatprep.subr.bf16.mxu1 %v1754_v25 }
 0x3fb   :  { %1729 = vmatpush1.bf16.msra.mxu0 %v1728_v30  ;;  %v1756_v30 = vpack.c.bf16 %v1201_v27, %v1199_v26 }
 0x3fc   :  { %1731 = vmatprep.subr.bf16.mxu0 %v1730_v47  ;;  %v1205_v47 = vld [vmem:[#allocation3 + $0xa50] sm:$0xff] }
 0x3fd   :  { %1757 = vmatpush1.bf16.msra.mxu1 %v1756_v30  ;;  %v1760_v33 = vpack.c.bf16 %v1205_v47, %v1203_v32 }
 0x3fe   :  { %1759 = vmatprep.subr.bf16.mxu1 %v1758_v31 }
 0x3ff   :  { %1733 = vmatpush1.bf16.msra.mxu0 %v1732_v43 }
 0x400   :  { %1735 = vmatprep.subr.bf16.mxu0 %v1734_v36 }
 0x401   :  { %1761 = vmatpush1.bf16.msra.mxu1 %v1760_v33  ;;  %v2061_v33 = vsub.s32 4, %v1957_v59 }
 0x403   :  { %1737 = vmatpush1.bf16.msra.mxu0 %v1736_v39 }
 0x404   :  { %1739 = vmatprep.subr.bf16.mxu0 %v1738_v45 }
 0x407   :  { %1741 = vmatpush1.bf16.msra.mxu0 %v1740_v49 }
 0x408   :  { %1743 = vmatprep.subr.bf16.mxu0 %v1742_v52 }
 0x40b   :  { %1745 = vmatpush1.bf16.msra.mxu0 %v1744_v10 }
 0x40c   :  { %1747 = vmatprep.subr.bf16.mxu0 %v1746_v14 }
 0x40f   :  { %1749 = vmatpush1.bf16.msra.mxu0 %v1748_v61 }
 0x4bb   :  { %v901_v34 = vpop.f32.mrb[2].mxu1 }
 0x4bc   :  { %v906_v43 = vrot.slane %v901_v34, 4  ;;  %v920_v35 = vmul.f32 %v901_v34, %v901_v34  ;;  %v903_v55 = vpop.f32.mrb[3].mxu1 }
 0x4bd   :  { %v912_v36 = vrot.slane %v903_v55, 4  ;;  %v921_v37 = vmul.f32 %v903_v55, %v903_v55 }
 0x4be   :  { %v907_v38 = vadd.f32 %v906_v43, %v901_v34  ;;  %v922_v39 = vrot.slane %v920_v35, 4 }
 0x4bf   :  { %v913_v40 = vadd.f32 %v912_v36, %v903_v55  ;;  %v928_v44 = vrot.slane %v921_v37, 4 }
 0x4c0   :  { %v908_v45 = vrot.slane %v907_v38, 2  ;;  %v923_v46 = vadd.f32 %v922_v39, %v920_v35 }
 0x4c1   :  { %v914_v48 = vrot.slane %v913_v40, 2  ;;  %v929_v49 = vadd.f32 %v928_v44, %v921_v37 }
 0x4c2   :  { %v909_v50 = vadd.f32 %v908_v45, %v907_v38  ;;  %v924_v51 = vrot.slane %v923_v46, 2 }
 0x4c3   :  { %v915_v52 = vadd.f32 %v914_v48, %v913_v40  ;;  %v930_v56 = vrot.slane %v929_v49, 2 }
 0x4c4   :  { %v910_v63 = vrot.slane %v909_v50, 1  ;;  %v925_v10 = vadd.f32 %v924_v51, %v923_v46 }
 0x4c5   :  { %v916_v11 = vrot.slane %v915_v52, 1  ;;  %v931_v12 = vadd.f32 %v930_v56, %v929_v49 }
 0x4c6   :  { %v911_v13 = vadd.f32 %v910_v63, %v909_v50  ;;  %v926_v14 = vrot.slane %v925_v10, 1 }
 0x4c7   :  { %v917_v15 = vadd.f32 %v916_v11, %v915_v52  ;;  %v932_v61 = vrot.slane %v931_v12, 1 }
 0x4c8   :  { %v918_v54 = vmul.f32 0.125, %v911_v13  ;;  %v927_v19 = vadd.f32 %v926_v14, %v925_v10  ;;  %v1210_v13 = vld [vmem:[#allocation3 + $0xa78] sm:$0xff]  ;;  %v1207_v14 = vld [vmem:[#allocation3 + $0xa60] sm:$0xff] }
 0x4c9   :  { %v919_v41 = vmul.f32 0.125, %v917_v15  ;;  %v933_v20 = vadd.f32 %v932_v61, %v931_v12  ;;  %v1208_v12 = vld [vmem:[#allocation3 + $0xa68] sm:$0xff]  ;;  %v1209_v15 = vld [vmem:[#allocation3 + $0xa70] sm:$0xff]  ;;  %v1214_v61 = vld [vmem:[#allocation3 + $0xa98] sm:$0xff] }
 0x4ca   :  { %v934_v21 = vmul.f32 0.125, %v927_v19  ;;  %v936_v22 = vmul.f32 %v918_v54, %v918_v54  ;;  %v1211_v19 = vld [vmem:[#allocation3 + $0xa80] sm:$0xff] }
 0x4cb   :  { %v935_v23 = vmul.f32 0.125, %v933_v20  ;;  %v937_v24 = vmul.f32 %v919_v41, %v919_v41  ;;  %v1215_v20 = vld [vmem:[#allocation3 + $0xaa0] sm:$0xff] }
 0x4cc   :  { %v938_v25 = vsub.f32 %v934_v21, %v936_v22  ;;  %v1217_v21 = vld [vmem:[#allocation3 + $0xab0] sm:$0xff] }
 0x4cd   :  { %v939_v26 = vsub.f32 %v935_v23, %v937_v24  ;;  %v1772_v22 = vpack.c.bf16 %v1217_v21, %v1215_v20  ;;  %v1220_v23 = vld [vmem:[#allocation3 + $0xac8] sm:$0xff]  ;;  %v1222_v24 = vld [vmem:[#allocation3 + $0xad8] sm:$0xff]  ;;  %v1247_v20 = vld [vmem:[#allocation3 + $0xba0] sm:$0xff] }
 0x4ce   :  { %v940_v27 = vmax.f32 %v938_v25, 0.0  ;;  %v1774_v25 = vpack.c.bf16 %v1222_v24, %v1220_v23  ;;  %v1249_v21 = vld [vmem:[#allocation3 + $0xbb0] sm:$0xff]  ;;  %v1252_v23 = vld [vmem:[#allocation3 + $0xbc8] sm:$0xff]  ;;  %v1254_v24 = vld [vmem:[#allocation3 + $0xbd8] sm:$0xff] }
 0x4cf   :  { %v941_v28 = vmax.f32 %v939_v26, 0.0  ;;  %v1219_v26 = vld [vmem:[#allocation3 + $0xac0] sm:$0xff] }
 0x4d0   :  { %v942_v29 = vadd.f32 1e-05, %v940_v27  ;;  %v1221_v27 = vld [vmem:[#allocation3 + $0xad0] sm:$0xff] }
 0x4d1   :  { %v943_v30 = vadd.f32 1e-05, %v941_v28  ;;  %v1776_v28 = vpack.c.bf16 %v1221_v27, %v1219_v26  ;;  %v1251_v26 = vld [vmem:[#allocation3 + $0xbc0] sm:$0xff]  ;;  %v1253_v27 = vld [vmem:[#allocation3 + $0xbd0] sm:$0xff] }
 0x4d2   :  { %1836 = vrsqrt.f32 %v942_v29  ;;  %v1224_v29 = vld [vmem:[#allocation3 + $0xae8] sm:$0xff] }
 0x4d3   :  { %1838 = vrsqrt.f32 %v943_v30  ;;  %v1226_v30 = vld [vmem:[#allocation3 + $0xaf8] sm:$0xff] }
 0x4dc   :  { %v1837_v31 = vpop.eup %1836 }
 0x4dd   :  { %v1839_v32 = vpop.eup %1838  ;;  %v946_v47 = vmul.f32 %v2040_v58, %v1837_v31  ;;  %v1778_v31 = vpack.c.bf16 %v1226_v30, %v1224_v29  ;;  %v1256_v29 = vld [vmem:[#allocation3 + $0xbe8] sm:$0xff]  ;;  %v1258_v30 = vld [vmem:[#allocation3 + $0xbf8] sm:$0xff] }
 0x4de   :  { %v947_v43 = vmul.f32 %v2046_v2, %v1839_v32  ;;  %v1223_v32 = vld [vmem:[#allocation3 + $0xae0] sm:$0xff] }
 0x4df   :  { %v948_v35 = vmul.f32 %v946_v47, %v918_v54  ;;  %v961_v38 = vrot.slane %v946_v47, %v2061_v33  ;;  %v1225_v47 = vld [vmem:[#allocation3 + $0xaf0] sm:$0xff] }
 0x4e0   :  { %v949_v36 = vmul.f32 %v947_v43, %v919_v41  ;;  %v965_v40 = vrot.slane %v947_v43, %v2061_v33  ;;  %v1213_v41 = vld [vmem:[#allocation3 + $0xa90] sm:$0xff]  ;;  %v1780_v43 = vpack.c.bf16 %v1225_v47, %v1223_v32  ;;  %v1810_v32 = vpack.c.bf16 %v1258_v30, %v1256_v29 }
 0x4e1   :  { %v952_v37 = vrot.slane %v948_v35, 1  ;;  %v966_v46 = vmul.f32 %v961_v38, %v901_v34  ;;  %v1762_v34 = vpack.c.bf16 %v1210_v13, %v1208_v12  ;;  %v1768_v42 = vpack.c.bf16 %v1213_v41, %v1211_v19  ;;  %v1228_v35 = vld [vmem:[#allocation3 + $0xb08] sm:$0xff]  ;;  %v1227_v38 = vld [vmem:[#allocation3 + $0xb00] sm:$0xff]  ;;  %v1242_v13 = vld [vmem:[#allocation3 + $0xb78] sm:$0xff] }
 0x4e2   :  { %v953_v39 = vrot.slane %v949_v36, 1  ;;  %v967_v49 = vmul.f32 %v965_v40, %v903_v55  ;;  %v1764_v55 = vpack.c.bf16 %v1209_v15, %v1207_v14  ;;  %v1230_v36 = vld [vmem:[#allocation3 + $0xb18] sm:$0xff]  ;;  %v1240_v12 = vld [vmem:[#allocation3 + $0xb68] sm:$0xff]  ;;  %v1239_v14 = vld [vmem:[#allocation3 + $0xb60] sm:$0xff]  ;;  %v2076_v30 = vsub.s32 5, %v1957_v59 }
 0x4e3   :  { %v956_v44 = vsub.f32 %v2051_v62, %v952_v37  ;;  %1763 = vmatprep.subr.bf16.mxu1 %v1762_v34  ;;  %v1782_v37 = vpack.c.bf16 %v1230_v36, %v1228_v35  ;;  %v1794_v34 = vpack.c.bf16 %v1242_v13, %v1240_v12  ;;  %v1241_v15 = vld [vmem:[#allocation3 + $0xb70] sm:$0xff]  ;;  %v1243_v19 = vld [vmem:[#allocation3 + $0xb80] sm:$0xff] }
 0x4e4   :  { %v957_v45 = vsub.f32 %v2054_v57, %v953_v39  ;;  %1765 = vmatpush1.bf16.msra.mxu1 %v1764_v55  ;;  %v1229_v39 = vld [vmem:[#allocation3 + $0xb10] sm:$0xff]  ;;  %v1796_v55 = vpack.c.bf16 %v1241_v15, %v1239_v14 }
 0x4e5   :  { %v971_v48 = vrot.slane %v956_v44, %v2044_v0  ;;  %v1784_v40 = vpack.c.bf16 %v1229_v39, %v1227_v38  ;;  %v1232_v44 = vld [vmem:[#allocation3 + $0xb28] sm:$0xff]  ;;  %v1245_v41 = vld [vmem:[#allocation3 + $0xb90] sm:$0xff] }
 0x4e6   :  { %v975_v50 = vrot.slane %v957_v45, %v2044_v0  ;;  %v1212_v0 = vld [vmem:[#allocation3 + $0xa88] sm:$0xff]  ;;  %v1234_v45 = vld [vmem:[#allocation3 + $0xb38] sm:$0xff]  ;;  %v1257_v47 = vld [vmem:[#allocation3 + $0xbf0] sm:$0xff] }
 0x4e7   :  { %v976_v51 = vadd.f32 %v971_v48, %v966_v46  ;;  %v1766_v54 = vpack.c.bf16 %v1214_v61, %v1212_v0  ;;  %v1786_v46 = vpack.c.bf16 %v1234_v45, %v1232_v44  ;;  %v1231_v48 = vld [vmem:[#allocation3 + $0xb20] sm:$0xff]  ;;  %v1244_v0 = vld [vmem:[#allocation3 + $0xb88] sm:$0xff]  ;;  %v1246_v61 = vld [vmem:[#allocation3 + $0xb98] sm:$0xff] }
 0x4e8   :  { %v977_v52 = vadd.f32 %v975_v50, %v967_v49  ;;  %v1233_v49 = vld [vmem:[#allocation3 + $0xb30] sm:$0xff] }
 0x4e9   :  { %v978_v56 = vmax.f32 %v976_v51, 0.0  ;;  %1767 = vmatprep.subr.bf16.mxu1 %v1766_v54  ;;  %v1788_v50 = vpack.c.bf16 %v1233_v49, %v1231_v48  ;;  %v1236_v51 = vld [vmem:[#allocation3 + $0xb48] sm:$0xff]  ;;  %v1798_v54 = vpack.c.bf16 %v1246_v61, %v1244_v0 }
 0x4ea   :  { %v979_v63 = vmax.f32 %v977_v52, 0.0  ;;  %1769 = vmatpush1.bf16.msra.mxu1 %v1768_v42  ;;  %v1238_v52 = vld [vmem:[#allocation3 + $0xb58] sm:$0xff]  ;;  %v1800_v42 = vpack.c.bf16 %v1245_v41, %v1243_v19 }
 0x4eb   :  { %v980_v11 = vadd.f32 %v978_v56, %v558_v18  ;;  %v1790_v56 = vpack.c.bf16 %v1238_v52, %v1236_v51 }
 0x4ec   :  { %v981_v10 = vadd.f32 %v979_v63, %v559_v17  ;;  %v1218_v17 = vld [vmem:[#allocation3 + $0xab8] sm:$0xff]  ;;  %v1235_v63 = vld [vmem:[#allocation3 + $0xb40] sm:$0xff] }
 0x4ed   :  { %v1770_v18 = vpack.c.bf16 %v1218_v17, %v1216_v16  ;;  %v1248_v16 = vld [vmem:[#allocation3 + $0xba8] sm:$0xff]  ;;  %v1250_v17 = vld [vmem:[#allocation3 + $0xbb8] sm:$0xff] }
 0x4ee   :  { %1111 = vmatprep.mubr.f32.mxu0 %v981_v10  ;;  %v1237_v10 = vld [vmem:[#allocation3 + $0xb50] sm:$0xff] }
 0x4ef   :  { %1112 = vmatmul.mubr.f32.vlgmr.msra.gmra.mrb[4].mxu0 %v980_v11  ;;  %1771 = vmatprep.subr.bf16.mxu1 %v1770_v18  ;;  %v1792_v11 = vpack.c.bf16 %v1237_v10, %v1235_v63  ;;  %v1802_v18 = vpack.c.bf16 %v1250_v17, %v1248_v16 }
 0x4f0   :  { %1773 = vmatpush1.bf16.msra.mxu1 %v1772_v22  ;;  %v1804_v22 = vpack.c.bf16 %v1249_v21, %v1247_v20 }
 0x4f1   :  { %1775 = vmatprep.subr.bf16.mxu1 %v1774_v25  ;;  %v1806_v25 = vpack.c.bf16 %v1254_v24, %v1252_v23 }
 0x4f4   :  { %1777 = vmatpush1.bf16.msra.mxu1 %v1776_v28  ;;  %v1808_v28 = vpack.c.bf16 %v1253_v27, %v1251_v26 }
 0x4f5   :  { %1779 = vmatprep.subr.bf16.mxu1 %v1778_v31  ;;  %v1255_v31 = vld [vmem:[#allocation3 + $0xbe0] sm:$0xff] }
 0x4f8   :  { %1781 = vmatpush1.bf16.msra.mxu1 %v1780_v43  ;;  %v1812_v43 = vpack.c.bf16 %v1257_v47, %v1255_v31 }
 0x4f9   :  { %1783 = vmatprep.subr.bf16.mxu1 %v1782_v37 }
 0x4fc   :  { %1785 = vmatpush1.bf16.msra.mxu1 %v1784_v40 }
 0x4fd   :  { %1787 = vmatprep.subr.bf16.mxu1 %v1786_v46 }
 0x500   :  { %1789 = vmatpush1.bf16.msra.mxu1 %v1788_v50 }
 0x501   :  { %1791 = vmatprep.subr.bf16.mxu1 %v1790_v56 }
 0x504   :  { %1793 = vmatpush1.bf16.msra.mxu1 %v1792_v11 }
 0x505   :  { %1795 = vmatprep.subr.bf16.mxu1 %v1794_v34 }
 0x508   :  { %1797 = vmatpush1.bf16.msra.mxu1 %v1796_v55 }
 0x509   :  { %1799 = vmatprep.subr.bf16.mxu1 %v1798_v54 }
 0x50c   :  { %1801 = vmatpush1.bf16.msra.mxu1 %v1800_v42 }
 0x50d   :  { %1803 = vmatprep.subr.bf16.mxu1 %v1802_v18 }
 0x510   :  { %1805 = vmatpush1.bf16.msra.mxu1 %v1804_v22 }
 0x511   :  { %1807 = vmatprep.subr.bf16.mxu1 %v1806_v25 }
 0x514   :  { %1809 = vmatpush1.bf16.msra.mxu1 %v1808_v28 }
 0x515   :  { %1811 = vmatprep.subr.bf16.mxu1 %v1810_v32 }
 0x518   :  { %1813 = vmatpush1.bf16.msra.mxu1 %v1812_v43 }
 0x5c2   :  { %v1113_v35 = vpop.f32.mrb[4].mxu0 }
 0x5c3   :  { %v1118_v36 = vrot.slane %v1113_v35, 4  ;;  %v1132_v37 = vmul.f32 %v1113_v35, %v1113_v35  ;;  %v1115_v38 = vpop.f32.mrb[5].mxu0 }
 0x5c4   :  { %v1124_v39 = vrot.slane %v1115_v38, 4  ;;  %v1133_v40 = vmul.f32 %v1115_v38, %v1115_v38 }
 0x5c5   :  { %v1119_v44 = vadd.f32 %v1118_v36, %v1113_v35  ;;  %v1134_v45 = vrot.slane %v1132_v37, 4 }
 0x5c6   :  { %v1125_v46 = vadd.f32 %v1124_v39, %v1115_v38  ;;  %v1140_v48 = vrot.slane %v1133_v40, 4 }
 0x5c7   :  { %v1120_v49 = vrot.slane %v1119_v44, 2  ;;  %v1135_v50 = vadd.f32 %v1134_v45, %v1132_v37 }
 0x5c8   :  { %v1126_v51 = vrot.slane %v1125_v46, 2  ;;  %v1141_v52 = vadd.f32 %v1140_v48, %v1133_v40 }
 0x5c9   :  { %v1121_v56 = vadd.f32 %v1120_v49, %v1119_v44  ;;  %v1136_v63 = vrot.slane %v1135_v50, 2 }
 0x5ca   :  { %v1127_v10 = vadd.f32 %v1126_v51, %v1125_v46  ;;  %v1142_v11 = vrot.slane %v1141_v52, 2 }
 0x5cb   :  { %v1122_v12 = vrot.slane %v1121_v56, 1  ;;  %v1137_v13 = vadd.f32 %v1136_v63, %v1135_v50 }
 0x5cc   :  { %v1128_v34 = vrot.slane %v1127_v10, 1  ;;  %v1143_v14 = vadd.f32 %v1142_v11, %v1141_v52 }
 0x5cd   :  { %v1123_v15 = vadd.f32 %v1122_v12, %v1121_v56  ;;  %v1138_v55 = vrot.slane %v1137_v13, 1 }
 0x5ce   :  { %v1129_v0 = vadd.f32 %v1128_v34, %v1127_v10  ;;  %v1144_v61 = vrot.slane %v1143_v14, 1 }
 0x5cf   :  { %v1130_v54 = vmul.f32 0.125, %v1123_v15  ;;  %v1139_v19 = vadd.f32 %v1138_v55, %v1137_v13 }
 0x5d0   :  { %v1131_v41 = vmul.f32 0.125, %v1129_v0  ;;  %v1145_v42 = vadd.f32 %v1144_v61, %v1143_v14 }
 0x5d1   :  { %v1146_v16 = vmul.f32 0.125, %v1139_v19  ;;  %v1148_v17 = vmul.f32 %v1130_v54, %v1130_v54 }
 0x5d2   :  { %v1147_v18 = vmul.f32 0.125, %v1145_v42  ;;  %v1149_v20 = vmul.f32 %v1131_v41, %v1131_v41 }
 0x5d3   :  { %v1150_v21 = vsub.f32 %v1146_v16, %v1148_v17 }
 0x5d4   :  { %v1151_v22 = vsub.f32 %v1147_v18, %v1149_v20 }
 0x5d5   :  { %v1152_v23 = vmax.f32 %v1150_v21, 0.0 }
 0x5d6   :  { %v1153_v24 = vmax.f32 %v1151_v22, 0.0 }
 0x5d7   :  { %v1154_v25 = vadd.f32 1e-05, %v1152_v23 }
 0x5d8   :  { %v1155_v26 = vadd.f32 1e-05, %v1153_v24 }
 0x5d9   :  { %1840 = vrsqrt.f32 %v1154_v25 }
 0x5da   :  { %1842 = vrsqrt.f32 %v1155_v26 }
 0x5e3   :  { %v1841_v27 = vpop.eup %1840 }
 0x5e4   :  { %v1843_v28 = vpop.eup %1842  ;;  %v1158_v29 = vmul.f32 %v2040_v58, %v1841_v27 }
 0x5e5   :  { %v1159_v31 = vmul.f32 %v2046_v2, %v1843_v28 }
 0x5e6   :  { %v1160_v32 = vmul.f32 %v1158_v29, %v1130_v54  ;;  %v1173_v36 = vrot.slane %v1158_v29, %v2076_v30 }
 0x5e7   :  { %v1161_v47 = vmul.f32 %v1159_v31, %v1131_v41  ;;  %v1177_v39 = vrot.slane %v1159_v31, %v2076_v30 }
 0x5e8   :  { %v1164_v43 = vrot.slane %v1160_v32, 1  ;;  %v1178_v45 = vmul.f32 %v1173_v36, %v1113_v35 }
 0x5e9   :  { %v1165_v37 = vrot.slane %v1161_v47, 1  ;;  %v1179_v48 = vmul.f32 %v1177_v39, %v1115_v38 }
 0x5ea   :  { %v1168_v40 = vsub.f32 %v2051_v62, %v1164_v43 }
 0x5eb   :  { %v1169_v44 = vsub.f32 %v2054_v57, %v1165_v37 }
 0x5ec   :  { %v1183_v46 = vrot.slane %v1168_v40, %v2061_v33 }
 0x5ed   :  { %v1187_v59 = vrot.slane %v1169_v44, %v2061_v33 }
 0x5ee   :  { %v1188_v49 = vadd.f32 %v1183_v46, %v1178_v45 }
 0x5ef   :  { %v1189_v50 = vadd.f32 %v1187_v59, %v1179_v48 }
 0x5f0   :  { %v1190_v51 = vmax.f32 %v1188_v49, 0.0 }
 0x5f1   :  { %v1191_v52 = vmax.f32 %v1189_v50, 0.0 }
 0x5f2   :  { %v1192_v63 = vadd.f32 %v1190_v51, %v348_v9 }
 0x5f3   :  { %v1193_v56 = vadd.f32 %v1191_v52, %v349_v8 }
 0x5f5   :  { %1323 = vmatprep.mubr.f32.mxu1 %v1193_v56 }
 0x5f6   :  { %1324 = vmatmul.mubr.f32.vlgmr.msra.gmra.mrb[4].mxu1 %v1192_v63 }
 0x6c9   :  { %v1325_v10 = vpop.f32.mrb[4].mxu1 }
 0x6ca   :  { %v1330_v11 = vrot.slane %v1325_v10, 4  ;;  %v1344_v35 = vmul.f32 %v1325_v10, %v1325_v10  ;;  %v1327_v12 = vpop.f32.mrb[5].mxu1 }
 0x6cb   :  { %v1336_v13 = vrot.slane %v1327_v12, 4  ;;  %v1345_v38 = vmul.f32 %v1327_v12, %v1327_v12 }
 0x6cc   :  { %v1331_v34 = vadd.f32 %v1330_v11, %v1325_v10  ;;  %v1346_v33 = vrot.slane %v1344_v35, 4 }
 0x6cd   :  { %v1337_v14 = vadd.f32 %v1336_v13, %v1327_v12  ;;  %v1352_v15 = vrot.slane %v1345_v38, 4 }
 0x6ce   :  { %v1332_v55 = vrot.slane %v1331_v34, 2  ;;  %v1347_v0 = vadd.f32 %v1346_v33, %v1344_v35 }
 0x6cf   :  { %v1338_v61 = vrot.slane %v1337_v14, 2  ;;  %v1353_v3 = vadd.f32 %v1352_v15, %v1345_v38 }
 0x6d0   :  { %v1333_v8 = vadd.f32 %v1332_v55, %v1331_v34  ;;  %v1348_v54 = vrot.slane %v1347_v0, 2  ;;  %v1409_v34 = vrot.slane %v2051_v62, %v1981_v53 }
 0x6d1   :  { %v1339_v1 = vadd.f32 %v1338_v61, %v1337_v14  ;;  %v1354_v9 = vrot.slane %v1353_v3, 2 }
 0x6d2   :  { %v1334_v19 = vrot.slane %v1333_v8, 1  ;;  %v1349_v41 = vadd.f32 %v1348_v54, %v1347_v0 }
 0x6d3   :  { %v1340_v42 = vrot.slane %v1339_v1, 1  ;;  %v1355_v16 = vadd.f32 %v1354_v9, %v1353_v3 }
 0x6d4   :  { %v1335_v17 = vadd.f32 %v1334_v19, %v1333_v8  ;;  %v1350_v18 = vrot.slane %v1349_v41, 1 }
 0x6d5   :  { %v1341_v20 = vadd.f32 %v1340_v42, %v1339_v1  ;;  %v1356_v21 = vrot.slane %v1355_v16, 1 }
 0x6d6   :  { %v1342_v22 = vmul.f32 0.125, %v1335_v17  ;;  %v1351_v23 = vadd.f32 %v1350_v18, %v1349_v41 }
 0x6d7   :  { %v1343_v24 = vmul.f32 0.125, %v1341_v20  ;;  %v1357_v25 = vadd.f32 %v1356_v21, %v1355_v16 }
 0x6d8   :  { %v1358_v26 = vmul.f32 0.125, %v1351_v23  ;;  %v1360_v27 = vmul.f32 %v1342_v22, %v1342_v22 }
 0x6d9   :  { %v1359_v28 = vmul.f32 0.125, %v1357_v25  ;;  %v1361_v29 = vmul.f32 %v1343_v24, %v1343_v24 }
 0x6da   :  { %v1362_v31 = vsub.f32 %v1358_v26, %v1360_v27 }
 0x6db   :  { %v1363_v32 = vsub.f32 %v1359_v28, %v1361_v29 }
 0x6dc   :  { %v1364_v47 = vmax.f32 %v1362_v31, 0.0 }
 0x6dd   :  { %v1365_v43 = vmax.f32 %v1363_v32, 0.0 }
 0x6de   :  { %v1366_v36 = vadd.f32 1e-05, %v1364_v47 }
 0x6df   :  { %v1367_v37 = vadd.f32 1e-05, %v1365_v43 }
 0x6e0   :  { %1844 = vrsqrt.f32 %v1366_v36 }
 0x6e1   :  { %1846 = vrsqrt.f32 %v1367_v37 }
 0x6ea   :  { %v1845_v39 = vpop.eup %1844 }
 0x6eb   :  { %v1847_v40 = vpop.eup %1846  ;;  %v1370_v44 = vmul.f32 %v2040_v58, %v1845_v39 }
 0x6ec   :  { %v1371_v45 = vmul.f32 %v2046_v2, %v1847_v40 }
 0x6ed   :  { %v1372_v46 = vmul.f32 %v1370_v44, %v1342_v22  ;;  %v1385_v49 = vrot.slane %v1370_v44, %v1960_v60 }
 0x6ee   :  { %v1373_v48 = vmul.f32 %v1371_v45, %v1343_v24  ;;  %v1389_v51 = vrot.slane %v1371_v45, %v1960_v60  ;;  %v1413_v60 = vrot.slane %v2054_v57, %v1981_v53 }
 0x6ef   :  { %v1376_v59 = vrot.slane %v1372_v46, 1  ;;  %v1390_v63 = vmul.f32 %v1385_v49, %v1325_v10 }
 0x6f0   :  { %v1377_v50 = vrot.slane %v1373_v48, 1  ;;  %v1391_v35 = vmul.f32 %v1389_v51, %v1327_v12 }
 0x6f1   :  { %v1380_v52 = vsub.f32 %v2051_v62, %v1376_v59 }
 0x6f2   :  { %v1381_v56 = vsub.f32 %v2054_v57, %v1377_v50 }
 0x6f3   :  { %v1395_v11 = vrot.slane %v1380_v52, %v2076_v30 }
 0x6f4   :  { %v1399_v58 = vrot.slane %v1381_v56, %v2076_v30  ;;  %v1420_v30 = vstv %s2114_s3 }
 0x6f5   :  { %v1400_v13 = vadd.f32 %v1395_v11, %v1390_v63 }
 0x6f6   :  { %v1401_v2 = vadd.f32 %v1399_v58, %v1391_v35 }
 0x6f7   :  { %v1402_v38 = vmax.f32 %v1400_v13, 0.0 }
 0x6f8   :  { %v1403_v33 = vmax.f32 %v1401_v2, 0.0 }
 0x6f9   :  { %v1404_v14 = vadd.f32 %v1402_v38, %v139_v7 }
 0x6fa   :  { %v1405_v10 = vadd.f32 %v1403_v33, %v140_v6 }
 0x6fb   :  { %v1414_v15 = vmul.f32 %v1409_v34, %v1404_v14 }
 0x6fc   :  { %v1415_v12 = vmul.f32 %v1413_v60, %v1405_v10 }
 0x6fe   :  { %v1416_v55 = vadd.f32 %v1415_v12, %v1414_v15 }
 0x700   :  { %1417 = vadd.xlane.f32.xlu0 %v1416_v55 }
 0x78d   :  { %v1418_v62 = vpop.xlane.xlu0 %1417 }
 0x78e   :  { %v1421_v0 = vadd.f32 %v1420_v30, %v1418_v62 }
 0x790   :  { %1423 = vst.msk [vmem:[%s2115_s4] sm:$0xff] %vm1422_vm0, %v1421_v0 }
 0x791   :  { %1428 = vsyncpa [#allocation4], 1 }
 0x792   :  { %1429 = vsyncpa [#allocation6], 1 }

</bundles_post_ra>
